<compile_context>
chip_gen: v5e
topology: v5e:2x2
jax: 0.10.0
libtpu: 0.0.40
codegen_flags: <defaults>
</compile_context>

<pallas_src>
import functools

import jax
import jax.numpy as jnp
import numpy as np
from jax import lax
from jax.experimental import pallas as pl
from jax.experimental.pallas import tpu as pltpu


def _make_divisible(v, divisor, min_value=None):
    if min_value is None:
        min_value = divisor
    new_v = max(min_value, int(v + divisor / 2) // divisor * divisor)
    if new_v < 0.9 * v:
        new_v += divisor
    return new_v


def _apply_act(y, act):
    if act == "relu":
        return jnp.maximum(y, 0.0)
    if act == "hswish":
        # HardSwish(x) = x * relu6(x + 3) * 0.16666666666666666
        return y * (jnp.clip(y + 3.0, 0.0, 6.0) * 0.16666666666666666)
    return y


# --------------------------------------------------------------------------
# Fully fused MBConv layer kernel (one grid step == one group of samples).
#   expansion 1x1 (MXU) -> stage into zero-halo VMEM scratch -> depthwise kxk
#   with the stride folded into the tap slices (VPU) -> BN bias + act ->
#   SE (pool + 2 matmuls + hardsigmoid) -> projection 1x1 (MXU) -> +residual.
# Conv weights already have the BN scale folded in; biases are the BN shifts.
# In-kernel activation layout is (spatial, C); HBM I/O is channel-major
# (C, spatial) so HBM loads/stores are lane-dense.
# --------------------------------------------------------------------------
def _mbconv_kernel(*refs, k, s, H, W, Ho, Wo, ng, act, has_exp, has_se,
                   identity, matmul_dtype):
    it = iter(refs)
    x_ref = next(it)                                   # (ng, Cin, H*W)
    if has_exp:
        exp_w_ref, exp_b_ref = next(it), next(it)      # (Cin, C) md, (1, C) f32
    dw_w_ref, dw_b_ref = next(it), next(it)            # (k*k, C) f32, (1, C) f32
    if has_se:
        se_w1_ref, se_b1_ref = next(it), next(it)      # (C, Cr) md, (1, Cr) f32
        se_w2_ref, se_b2_ref = next(it), next(it)      # (Cr, C) md, (1, C) f32
    proj_w_ref, proj_b_ref = next(it), next(it)        # (C, Cout) md, (1, Cout)
    o_ref = next(it)                                   # (ng, Cout, Ho*Wo)
    pad_ref = next(it)                                 # VMEM (Hp, Wp, C) f32

    C = dw_w_ref.shape[-1]
    pad = (k - 1) // 2
    Hp, Wp = H + 2 * pad, W + 2 * pad
    md = matmul_dtype

    # Zero ONLY the halo border of the scratch.  Done every grid step (not just
    # at program_id == 0): with a "parallel" grid axis, each TensorCore of a
    # megacore chip has its own scratch instance and is not guaranteed to run
    # step 0.  The interior is fully overwritten below, so this is cheap.
    if pad > 0:
        pad_ref[pl.ds(0, pad), :, :] = jnp.zeros((pad, Wp, C), jnp.float32)
        pad_ref[pl.ds(pad + H, pad), :, :] = jnp.zeros((pad, Wp, C), jnp.float32)
        pad_ref[pl.ds(pad, H), pl.ds(0, pad), :] = jnp.zeros((H, pad, C),
                                                             jnp.float32)
        pad_ref[pl.ds(pad, H), pl.ds(pad + W, pad), :] = jnp.zeros((H, pad, C),
                                                                   jnp.float32)

    w_dw = dw_w_ref[...]                               # hoisted single load

    for n in range(ng):                                # ng is tiny (1 here)
        x_cs = x_ref[n].astype(jnp.float32)            # (Cin, H*W) channel-major
        x_sc = x_cs.T                                  # (H*W, Cin) spatial-major

        # ---- expansion 1x1 conv + folded BN + act (skipped if inp == hidden)
        if has_exp:
            h = jnp.dot(x_sc.astype(md), exp_w_ref[...],
                        preferred_element_type=jnp.float32)
            h = _apply_act(h + exp_b_ref[...], act)    # (H*W, C)
        else:
            h = x_sc                                   # Cin == C

        # ---- single dense store of the interior (halo already zero) --------
        pad_ref[pl.ds(pad, H), pl.ds(pad, W), :] = h.reshape(H, W, C)

        # ---- depthwise kxk conv, stride folded into the tap slices ----------
        acc = jnp.zeros((Ho, Wo, C), jnp.float32)
        for i in range(k):
            for j in range(k):
                if s == 1:
                    tap = pad_ref[pl.ds(i, Ho), pl.ds(j, Wo), :]
                else:
                    tap = pad_ref[pl.ds(i, Ho, stride=s),
                                  pl.ds(j, Wo, stride=s), :]
                t = i * k + j
                acc = acc + tap * w_dw[t:t + 1, :].reshape(1, 1, C)
        flat = _apply_act(acc.reshape(Ho * Wo, C) + dw_b_ref[...], act)

        # ---- Squeeze-and-Excite: pool -> fc+relu -> fc+hardsigmoid -> scale -
        if has_se:
            m = jnp.sum(flat, axis=0, keepdims=True) * (1.0 / (Ho * Wo))
            g = jnp.dot(m.astype(md), se_w1_ref[...],
                        preferred_element_type=jnp.float32)
            g = jnp.maximum(g + se_b1_ref[...], 0.0)
            g = jnp.dot(g.astype(md), se_w2_ref[...],
                        preferred_element_type=jnp.float32)
            g = jnp.clip(g + se_b2_ref[...] + 3.0, 0.0, 6.0) * 0.16666666666666666
            flat = flat * g

        # ---- projection 1x1 + folded BN; transpose to lane-dense (Cout, HW) -
        out = jnp.dot(flat.astype(md), proj_w_ref[...],
                      preferred_element_type=jnp.float32)
        out = (out + proj_b_ref[...]).T                # (Cout, Ho*Wo)
        if identity:
            out = out + x_cs                           # Cin == Cout, s == 1
        o_ref[n] = out.astype(o_ref.dtype)


def mbconv_forward(x, prm, inp, cfg, matmul_dtype=jnp.float32):
    """One MBConv layer as a single fused pallas_call. x is (N, Cin, H, W)."""
    k, hidden, oup, use_se, use_hs, s = cfg
    if hidden <= 0:
        hidden = inp * 4
    act = "hswish" if use_hs else "relu"
    identity = (s == 1 and inp == oup)
    has_exp = (inp != hidden)
    N, _, H, W = x.shape
    Ho = (H - 1) // s + 1
    Wo = (W - 1) // s + 1
    Cin, C, Cout = inp, hidden, oup
    pad = (k - 1) // 2
    md = matmul_dtype

    # 2-way "parallel" sample grouping feeds both TensorCores on megacore
    # chips (v7x); remaining samples of a group are looped in-kernel so
    # single-core chips (v5e/v6e) see only n_groups pipeline steps.
    n_groups = 2 if (N % 2 == 0 and N >= 2) else 1
    ng = N // n_groups

    # ---- Fold BN (eval mode) scales into conv weights at prep time ----------
    dw_w = (prm["dw_w"] * prm["bn2"][0]).reshape(k * k, C).astype(jnp.float32)
    dw_b = prm["bn2"][1].reshape(1, C)
    proj_w = (prm["proj_w"] * prm["bn3"][0][None, :]).astype(md)
    proj_b = prm["bn3"][1].reshape(1, Cout)

    x_flat = x.reshape(N, Cin, H * W)                  # NCHW, spatial flattened

    args = [x_flat]
    in_specs = [pl.BlockSpec((ng, Cin, H * W), lambda g: (g, 0, 0))]

    def _add_full(a):
        args.append(a)
        in_specs.append(pl.BlockSpec(a.shape, lambda g: (0, 0)))

    if has_exp:
        _add_full((prm["exp_w"] * prm["bn1"][0][None, :]).astype(md))
        _add_full(prm["bn1"][1].reshape(1, C))
    _add_full(dw_w)
    _add_full(dw_b)
    if use_se:
        cr = prm["se_w1"].shape[1]
        _add_full(prm["se_w1"].astype(md))
        _add_full(prm["se_b1"].reshape(1, cr))
        _add_full(prm["se_w2"].astype(md))
        _add_full(prm["se_b2"].reshape(1, C))
    _add_full(proj_w)
    _add_full(proj_b)

    kernel = functools.partial(
        _mbconv_kernel, k=k, s=s, H=H, W=W, Ho=Ho, Wo=Wo, ng=ng, act=act,
        has_exp=has_exp, has_se=bool(use_se), identity=identity,
        matmul_dtype=md)

    out = pl.pallas_call(
        kernel,
        out_shape=jax.ShapeDtypeStruct((N, Cout, Ho * Wo), x.dtype),
        grid=(n_groups,),
        in_specs=in_specs,
        out_specs=pl.BlockSpec((ng, Cout, Ho * Wo), lambda g: (g, 0, 0)),
        scratch_shapes=[pltpu.VMEM((H + 2 * pad, W + 2 * pad, C), jnp.float32)],
        compiler_params=pltpu.CompilerParams(
            dimension_semantics=("parallel",)),
    )(*args)
    return out.reshape(N, Cout, Ho, Wo)


# --------------------------------------------------------------------------
# Parameters & block-level glue
# --------------------------------------------------------------------------
def init_mbconv_params(key, inp, cfg):
    k, hidden, oup, use_se, use_hs, s = cfg
    if hidden <= 0:
        hidden = inp * 4
    ks = jax.random.split(key, 10)

    def bn_fold(kk, c):
        k0, k1, k2, k3 = jax.random.split(kk, 4)
        gamma = jax.random.uniform(k0, (c,), jnp.float32, 0.5, 1.5)
        beta = 0.1 * jax.random.normal(k1, (c,), jnp.float32)
        mean = 0.1 * jax.random.normal(k2, (c,), jnp.float32)
        var = jax.random.uniform(k3, (c,), jnp.float32, 0.5, 1.5)
        scale = gamma / jnp.sqrt(var + 1e-5)
        return scale, beta - mean * scale

    prm = {}
    if inp != hidden:
        prm["exp_w"] = 0.3 * jax.random.normal(ks[0], (inp, hidden), jnp.float32)
        prm["bn1"] = bn_fold(ks[1], hidden)
    prm["dw_w"] = 0.3 * jax.random.normal(ks[2], (k, k, hidden), jnp.float32)
    prm["bn2"] = bn_fold(ks[3], hidden)
    if use_se:
        cr = _make_divisible(hidden // 4, 8)
        prm["se_w1"] = 0.3 * jax.random.normal(ks[4], (hidden, cr), jnp.float32)
        prm["se_b1"] = 0.1 * jax.random.normal(ks[5], (cr,), jnp.float32)
        prm["se_w2"] = 0.3 * jax.random.normal(ks[6], (cr, hidden), jnp.float32)
        prm["se_b2"] = 0.1 * jax.random.normal(ks[7], (hidden,), jnp.float32)
    prm["proj_w"] = 0.3 * jax.random.normal(ks[8], (hidden, oup), jnp.float32)
    prm["bn3"] = bn_fold(ks[9], oup)
    return prm


def mbconv_block_forward(x_nchw, params, cfgs, inplanes, width_mult=1,
                         min_planes=8, matmul_dtype=jnp.float32):
    # NCHW is already channel-major -> no boundary transposes needed.
    x = x_nchw
    inp = inplanes
    for prm, (k, t, c, use_se, use_hs, s) in zip(params, cfgs):
        oup = _make_divisible(c * width_mult, min_planes)
        x = mbconv_forward(x, prm, inp, (k, t, oup, use_se, use_hs, s),
                           matmul_dtype=matmul_dtype)
        inp = oup
    return x


# --------------------------------------------------------------------------
# Pure-JAX reference (NHWC) for validation
# --------------------------------------------------------------------------
def _ref_mbconv(x, prm, inp, cfg):
    k, hidden, oup, use_se, use_hs, s = cfg
    if hidden <= 0:
        hidden = inp * 4
    act = "hswish" if use_hs else "relu"
    identity = (s == 1 and inp == oup)
    h = x
    if inp != hidden:
        h = _apply_act(jnp.einsum("nhwc,cd->nhwd", h, prm["exp_w"])
                       * prm["bn1"][0] + prm["bn1"][1], act)
    pad = (k - 1) // 2
    C = hidden
    dw = prm["dw_w"].reshape(k, k, 1, C)
    h = lax.conv_general_dilated(h, dw, window_strides=(s, s),
                                 padding=((pad, pad), (pad, pad)),
                                 dimension_numbers=("NHWC", "HWIO", "NHWC"),
                                 feature_group_count=C)
    h = _apply_act(h * prm["bn2"][0] + prm["bn2"][1], act)
    if use_se:
        m = jnp.mean(h, axis=(1, 2), keepdims=True)
        t1 = jnp.maximum(jnp.einsum("nijc,cd->nijd", m, prm["se_w1"]) + prm["se_b1"], 0.0)
        g = jnp.einsum("nijd,dc->nijc", t1, prm["se_w2"]) + prm["se_b2"]
        g = jnp.clip(g + 3.0, 0.0, 6.0) * 0.16666666666666666
        h = h * g
    out = jnp.einsum("nhwc,cd->nhwd", h, prm["proj_w"]) * prm["bn3"][0] + prm["bn3"][1]
    if identity:
        out = out + x
    return out


if __name__ == "__main__":
    key = jax.random.PRNGKey(0)
    # cfgs: (kernel k, hidden_dim t, out channels c, use_se, use_hs, stride)
    cfgs = [
        (3, 16, 16, 1, 1, 1),  # expand branch, SE, HardSwish
        (3, 32, 24, 0, 1, 2),  # expand branch, stride 2
        (3, 24, 24, 1, 0, 1),  # inp == hidden branch, residual, ReLU
    ]
    inplanes = 8
    N, H, W = 2, 16, 16

    kx, kp = jax.random.split(key)
    x_nchw = jax.random.normal(kx, (N, inplanes, H, W), jnp.float32)

    params = []
    inp = inplanes
    for cfg in cfgs:
        k_, t, c, use_se, use_hs, s = cfg
        oup = _make_divisible(c * 1, 8)
        kp, sub = jax.random.split(kp)
        params.append(init_mbconv_params(sub, inp, (k_, t, oup, use_se, use_hs, s)))
        inp = oup

    # Pure-JAX f32 reference.
    xr = jnp.transpose(x_nchw, (0, 2, 3, 1))
    inp = inplanes
    for prm, (k_, t, c, use_se, use_hs, s) in zip(params, cfgs):
        oup = _make_divisible(c * 1, 8)
        xr = _ref_mbconv(xr, prm, inp, (k_, t, oup, use_se, use_hs, s))
        inp = oup
    ref = jnp.transpose(xr, (0, 3, 1, 2))

    # f32 MXU operands: exact-path check.
    out_f32 = jax.block_until_ready(
        mbconv_block_forward(x_nchw, params, cfgs, inplanes,
                             matmul_dtype=jnp.float32))
    np.testing.assert_allclose(np.asarray(out_f32), np.asarray(ref),
                               rtol=2e-3, atol=2e-3)

    # bf16 MXU operands (v6e/v7x fast path), f32 accumulation: looser check.
    out_bf16 = jax.block_until_ready(
        mbconv_block_forward(x_nchw, params, cfgs, inplanes,
                             matmul_dtype=jnp.bfloat16))
    np.testing.assert_allclose(np.asarray(out_bf16), np.asarray(ref),
                               rtol=5e-2, atol=5e-2)

    print("KERNEL_OK")
</pallas_src>

<mosaic_0001>
module attributes {stable_mosaic.version = 11 : i64} {
  func.func @_mbconv_kernel(%arg0: i32, %arg1: memref<1x8x256xf32, #tpu.memory_space<vmem>>, %arg2: memref<8x16xf32, #tpu.memory_space<vmem>>, %arg3: memref<1x16xf32, #tpu.memory_space<vmem>>, %arg4: memref<9x16xf32, #tpu.memory_space<vmem>>, %arg5: memref<1x16xf32, #tpu.memory_space<vmem>>, %arg6: memref<16x8xf32, #tpu.memory_space<vmem>>, %arg7: memref<1x8xf32, #tpu.memory_space<vmem>>, %arg8: memref<8x16xf32, #tpu.memory_space<vmem>>, %arg9: memref<1x16xf32, #tpu.memory_space<vmem>>, %arg10: memref<16x16xf32, #tpu.memory_space<vmem>>, %arg11: memref<1x16xf32, #tpu.memory_space<vmem>>, %arg12: memref<1x16x256xf32, #tpu.memory_space<vmem>>, %arg13: memref<18x18x16xf32, #tpu.memory_space<vmem>>) attributes {dimension_semantics = [#tpu.dimension_semantics<parallel>], iteration_bounds = array<i64: 2>, scalar_prefetch = 0 : i64, scratch_operands = 1 : i64, tpu.core_type = #tpu.core_type<tc>, window_params = [{transform_indices = @transform_0, window_bounds = array<i64: 1, 8, 256>}, {pipeline_mode = #tpu.pipeline_mode<synchronous>, transform_indices = @transform_1, window_bounds = array<i64: 8, 16>}, {pipeline_mode = #tpu.pipeline_mode<synchronous>, transform_indices = @transform_2, window_bounds = array<i64: 1, 16>}, {pipeline_mode = #tpu.pipeline_mode<synchronous>, transform_indices = @transform_3, window_bounds = array<i64: 9, 16>}, {pipeline_mode = #tpu.pipeline_mode<synchronous>, transform_indices = @transform_4, window_bounds = array<i64: 1, 16>}, {pipeline_mode = #tpu.pipeline_mode<synchronous>, transform_indices = @transform_5, window_bounds = array<i64: 16, 8>}, {pipeline_mode = #tpu.pipeline_mode<synchronous>, transform_indices = @transform_6, window_bounds = array<i64: 1, 8>}, {pipeline_mode = #tpu.pipeline_mode<synchronous>, transform_indices = @transform_7, window_bounds = array<i64: 8, 16>}, {pipeline_mode = #tpu.pipeline_mode<synchronous>, transform_indices = @transform_8, window_bounds = array<i64: 1, 16>}, {pipeline_mode = #tpu.pipeline_mode<synchronous>, transform_indices = @transform_9, window_bounds = array<i64: 16, 16>}, {pipeline_mode = #tpu.pipeline_mode<synchronous>, transform_indices = @transform_10, window_bounds = array<i64: 1, 16>}, {transform_indices = @transform_11, window_bounds = array<i64: 1, 16, 256>}]} {
    %cst = arith.constant 0.000000e+00 : f32
    %0 = vector.broadcast %cst : f32 to vector<1x18x16xf32>
    %c0 = arith.constant 0 : index
    %c0_0 = arith.constant 0 : index
    %c0_1 = arith.constant 0 : index
    %1 = vector.load %arg13[%c0, %c0_0, %c0_1] : memref<18x18x16xf32, #tpu.memory_space<vmem>>, vector<1x18x16xf32>
    tpu.vector_store %arg13[%c0, %c0_0, %c0_1], %0 {strides = array<i32>} : memref<18x18x16xf32, #tpu.memory_space<vmem>>, vector<1x18x16xf32>,
    %cst_2 = arith.constant 0.000000e+00 : f32
    %2 = vector.broadcast %cst_2 : f32 to vector<1x18x16xf32>
    %c17 = arith.constant 17 : index
    %c0_3 = arith.constant 0 : index
    %c0_4 = arith.constant 0 : index
    %3 = vector.load %arg13[%c17, %c0_3, %c0_4] : memref<18x18x16xf32, #tpu.memory_space<vmem>>, vector<1x18x16xf32>
    tpu.vector_store %arg13[%c17, %c0_3, %c0_4], %2 {strides = array<i32>} : memref<18x18x16xf32, #tpu.memory_space<vmem>>, vector<1x18x16xf32>,
    %cst_5 = arith.constant 0.000000e+00 : f32
    %4 = vector.broadcast %cst_5 : f32 to vector<16x1x16xf32>
    %c1 = arith.constant 1 : index
    %c0_6 = arith.constant 0 : index
    %c0_7 = arith.constant 0 : index
    %5 = vector.load %arg13[%c1, %c0_6, %c0_7] : memref<18x18x16xf32, #tpu.memory_space<vmem>>, vector<16x1x16xf32>
    tpu.vector_store %arg13[%c1, %c0_6, %c0_7], %4 {strides = array<i32>} : memref<18x18x16xf32, #tpu.memory_space<vmem>>, vector<16x1x16xf32>,
    %cst_8 = arith.constant 0.000000e+00 : f32
    %6 = vector.broadcast %cst_8 : f32 to vector<16x1x16xf32>
    %c1_9 = arith.constant 1 : index
    %c17_10 = arith.constant 17 : index
    %c0_11 = arith.constant 0 : index
    %7 = vector.load %arg13[%c1_9, %c17_10, %c0_11] : memref<18x18x16xf32, #tpu.memory_space<vmem>>, vector<16x1x16xf32>
    tpu.vector_store %arg13[%c1_9, %c17_10, %c0_11], %6 {strides = array<i32>} : memref<18x18x16xf32, #tpu.memory_space<vmem>>, vector<16x1x16xf32>,
    %c0_12 = arith.constant 0 : index
    %c0_13 = arith.constant 0 : index
    %8 = vector.load %arg4[%c0_12, %c0_13] : memref<9x16xf32, #tpu.memory_space<vmem>>, vector<9x16xf32>
    %c0_14 = arith.constant 0 : index
    %c0_15 = arith.constant 0 : index
    %c0_16 = arith.constant 0 : index
    %9 = vector.load %arg1[%c0_14, %c0_15, %c0_16] : memref<1x8x256xf32, #tpu.memory_space<vmem>>, vector<1x8x256xf32>
    %10 = vector.shape_cast %9 : vector<1x8x256xf32> to vector<8x256xf32>
    %11 = tpu.transpose %10, [1, 0] : vector<8x256xf32> -> vector<256x8xf32>
    %c0_17 = arith.constant 0 : index
    %c0_18 = arith.constant 0 : index
    %12 = vector.load %arg2[%c0_17, %c0_18] : memref<8x16xf32, #tpu.memory_space<vmem>>, vector<8x16xf32>
    %cst_19 = arith.constant dense<0.000000e+00> : vector<256x16xf32>
    %13 = tpu.matmul %11, %12, %cst_19 {dimension_numbers = #tpu.dot_dimension_numbers<[1], [0], [0], [1], [0, 0, 1, 1], [], []>} : vector<256x8xf32>, vector<8x16xf32>, vector<256x16xf32> -> vector<256x16xf32>
    %c0_20 = arith.constant 0 : index
    %c0_21 = arith.constant 0 : index
    %14 = vector.load %arg3[%c0_20, %c0_21] : memref<1x16xf32, #tpu.memory_space<vmem>>, vector<1x16xf32>
    %15 = vector.broadcast %14 : vector<1x16xf32> to vector<256x16xf32>
    %16 = arith.addf %13, %15 : vector<256x16xf32>
    %cst_22 = arith.constant 3.000000e+00 : f32
    %17 = vector.broadcast %cst_22 : f32 to vector<256x16xf32>
    %18 = arith.addf %16, %17 : vector<256x16xf32>
    %cst_23 = arith.constant 0.000000e+00 : f32
    %cst_24 = arith.constant 6.000000e+00 : f32
    %19 = vector.broadcast %cst_23 : f32 to vector<256x16xf32>
    %20 = arith.maximumf %19, %18 : vector<256x16xf32>
    %21 = vector.broadcast %cst_24 : f32 to vector<256x16xf32>
    %22 = arith.minimumf %21, %20 : vector<256x16xf32>
    %cst_25 = arith.constant 0.166666672 : f32
    %23 = vector.broadcast %cst_25 : f32 to vector<256x16xf32>
    %24 = arith.mulf %22, %23 : vector<256x16xf32>
    %25 = arith.mulf %16, %24 : vector<256x16xf32>
    %26 = vector.shape_cast %25 : vector<256x16xf32> to vector<16x16x16xf32>
    %c1_26 = arith.constant 1 : index
    %c1_27 = arith.constant 1 : index
    %c0_28 = arith.constant 0 : index
    %27 = vector.load %arg13[%c1_26, %c1_27, %c0_28] : memref<18x18x16xf32, #tpu.memory_space<vmem>>, vector<16x16x16xf32>
    tpu.vector_store %arg13[%c1_26, %c1_27, %c0_28], %26 {strides = array<i32>} : memref<18x18x16xf32, #tpu.memory_space<vmem>>, vector<16x16x16xf32>,
    %cst_29 = arith.constant 0.000000e+00 : f32
    %28 = vector.broadcast %cst_29 : f32 to vector<16x16x16xf32>
    %c0_30 = arith.constant 0 : index
    %c0_31 = arith.constant 0 : index
    %c0_32 = arith.constant 0 : index
    %29 = vector.load %arg13[%c0_30, %c0_31, %c0_32] : memref<18x18x16xf32, #tpu.memory_space<vmem>>, vector<16x16x16xf32>
    %30 = vector.extract_strided_slice %8 {offsets = [0, 0], sizes = [1, 16], strides = [1, 1]} : vector<9x16xf32> to vector<1x16xf32>
    %31 = vector.shape_cast %30 : vector<1x16xf32> to vector<1x1x16xf32>
    %32 = vector.broadcast %31 : vector<1x1x16xf32> to vector<16x16x16xf32>
    %33 = arith.mulf %29, %32 : vector<16x16x16xf32>
    %34 = arith.addf %28, %33 : vector<16x16x16xf32>
    %c0_33 = arith.constant 0 : index
    %c1_34 = arith.constant 1 : index
    %c0_35 = arith.constant 0 : index
    %35 = vector.load %arg13[%c0_33, %c1_34, %c0_35] : memref<18x18x16xf32, #tpu.memory_space<vmem>>, vector<16x16x16xf32>
    %36 = vector.extract_strided_slice %8 {offsets = [1, 0], sizes = [1, 16], strides = [1, 1]} : vector<9x16xf32> to vector<1x16xf32>
    %37 = vector.shape_cast %36 : vector<1x16xf32> to vector<1x1x16xf32>
    %38 = vector.broadcast %37 : vector<1x1x16xf32> to vector<16x16x16xf32>
    %39 = arith.mulf %35, %38 : vector<16x16x16xf32>
    %40 = arith.addf %34, %39 : vector<16x16x16xf32>
    %c0_36 = arith.constant 0 : index
    %c2 = arith.constant 2 : index
    %c0_37 = arith.constant 0 : index
    %41 = vector.load %arg13[%c0_36, %c2, %c0_37] : memref<18x18x16xf32, #tpu.memory_space<vmem>>, vector<16x16x16xf32>
    %42 = vector.extract_strided_slice %8 {offsets = [2, 0], sizes = [1, 16], strides = [1, 1]} : vector<9x16xf32> to vector<1x16xf32>
    %43 = vector.shape_cast %42 : vector<1x16xf32> to vector<1x1x16xf32>
    %44 = vector.broadcast %43 : vector<1x1x16xf32> to vector<16x16x16xf32>
    %45 = arith.mulf %41, %44 : vector<16x16x16xf32>
    %46 = arith.addf %40, %45 : vector<16x16x16xf32>
    %c1_38 = arith.constant 1 : index
    %c0_39 = arith.constant 0 : index
    %c0_40 = arith.constant 0 : index
    %47 = vector.load %arg13[%c1_38, %c0_39, %c0_40] : memref<18x18x16xf32, #tpu.memory_space<vmem>>, vector<16x16x16xf32>
    %48 = vector.extract_strided_slice %8 {offsets = [3, 0], sizes = [1, 16], strides = [1, 1]} : vector<9x16xf32> to vector<1x16xf32>
    %49 = vector.shape_cast %48 : vector<1x16xf32> to vector<1x1x16xf32>
    %50 = vector.broadcast %49 : vector<1x1x16xf32> to vector<16x16x16xf32>
    %51 = arith.mulf %47, %50 : vector<16x16x16xf32>
    %52 = arith.addf %46, %51 : vector<16x16x16xf32>
    %c1_41 = arith.constant 1 : index
    %c1_42 = arith.constant 1 : index
    %c0_43 = arith.constant 0 : index
    %53 = vector.load %arg13[%c1_41, %c1_42, %c0_43] : memref<18x18x16xf32, #tpu.memory_space<vmem>>, vector<16x16x16xf32>
    %54 = vector.extract_strided_slice %8 {offsets = [4, 0], sizes = [1, 16], strides = [1, 1]} : vector<9x16xf32> to vector<1x16xf32>
    %55 = vector.shape_cast %54 : vector<1x16xf32> to vector<1x1x16xf32>
    %56 = vector.broadcast %55 : vector<1x1x16xf32> to vector<16x16x16xf32>
    %57 = arith.mulf %53, %56 : vector<16x16x16xf32>
    %58 = arith.addf %52, %57 : vector<16x16x16xf32>
    %c1_44 = arith.constant 1 : index
    %c2_45 = arith.constant 2 : index
    %c0_46 = arith.constant 0 : index
    %59 = vector.load %arg13[%c1_44, %c2_45, %c0_46] : memref<18x18x16xf32, #tpu.memory_space<vmem>>, vector<16x16x16xf32>
    %60 = vector.extract_strided_slice %8 {offsets = [5, 0], sizes = [1, 16], strides = [1, 1]} : vector<9x16xf32> to vector<1x16xf32>
    %61 = vector.shape_cast %60 : vector<1x16xf32> to vector<1x1x16xf32>
    %62 = vector.broadcast %61 : vector<1x1x16xf32> to vector<16x16x16xf32>
    %63 = arith.mulf %59, %62 : vector<16x16x16xf32>
    %64 = arith.addf %58, %63 : vector<16x16x16xf32>
    %c2_47 = arith.constant 2 : index
    %c0_48 = arith.constant 0 : index
    %c0_49 = arith.constant 0 : index
    %65 = vector.load %arg13[%c2_47, %c0_48, %c0_49] : memref<18x18x16xf32, #tpu.memory_space<vmem>>, vector<16x16x16xf32>
    %66 = vector.extract_strided_slice %8 {offsets = [6, 0], sizes = [1, 16], strides = [1, 1]} : vector<9x16xf32> to vector<1x16xf32>
    %67 = vector.shape_cast %66 : vector<1x16xf32> to vector<1x1x16xf32>
    %68 = vector.broadcast %67 : vector<1x1x16xf32> to vector<16x16x16xf32>
    %69 = arith.mulf %65, %68 : vector<16x16x16xf32>
    %70 = arith.addf %64, %69 : vector<16x16x16xf32>
    %c2_50 = arith.constant 2 : index
    %c1_51 = arith.constant 1 : index
    %c0_52 = arith.constant 0 : index
    %71 = vector.load %arg13[%c2_50, %c1_51, %c0_52] : memref<18x18x16xf32, #tpu.memory_space<vmem>>, vector<16x16x16xf32>
    %72 = vector.extract_strided_slice %8 {offsets = [7, 0], sizes = [1, 16], strides = [1, 1]} : vector<9x16xf32> to vector<1x16xf32>
    %73 = vector.shape_cast %72 : vector<1x16xf32> to vector<1x1x16xf32>
    %74 = vector.broadcast %73 : vector<1x1x16xf32> to vector<16x16x16xf32>
    %75 = arith.mulf %71, %74 : vector<16x16x16xf32>
    %76 = arith.addf %70, %75 : vector<16x16x16xf32>
    %c2_53 = arith.constant 2 : index
    %c2_54 = arith.constant 2 : index
    %c0_55 = arith.constant 0 : index
    %77 = vector.load %arg13[%c2_53, %c2_54, %c0_55] : memref<18x18x16xf32, #tpu.memory_space<vmem>>, vector<16x16x16xf32>
    %78 = vector.extract_strided_slice %8 {offsets = [8, 0], sizes = [1, 16], strides = [1, 1]} : vector<9x16xf32> to vector<1x16xf32>
    %79 = vector.shape_cast %78 : vector<1x16xf32> to vector<1x1x16xf32>
    %80 = vector.broadcast %79 : vector<1x1x16xf32> to vector<16x16x16xf32>
    %81 = arith.mulf %77, %80 : vector<16x16x16xf32>
    %82 = arith.addf %76, %81 : vector<16x16x16xf32>
    %83 = vector.shape_cast %82 : vector<16x16x16xf32> to vector<256x16xf32>
    %c0_56 = arith.constant 0 : index
    %c0_57 = arith.constant 0 : index
    %84 = vector.load %arg5[%c0_56, %c0_57] : memref<1x16xf32, #tpu.memory_space<vmem>>, vector<1x16xf32>
    %85 = vector.broadcast %84 : vector<1x16xf32> to vector<256x16xf32>
    %86 = arith.addf %83, %85 : vector<256x16xf32>
    %cst_58 = arith.constant 3.000000e+00 : f32
    %87 = vector.broadcast %cst_58 : f32 to vector<256x16xf32>
    %88 = arith.addf %86, %87 : vector<256x16xf32>
    %cst_59 = arith.constant 0.000000e+00 : f32
    %cst_60 = arith.constant 6.000000e+00 : f32
    %89 = vector.broadcast %cst_59 : f32 to vector<256x16xf32>
    %90 = arith.maximumf %89, %88 : vector<256x16xf32>
    %91 = vector.broadcast %cst_60 : f32 to vector<256x16xf32>
    %92 = arith.minimumf %91, %90 : vector<256x16xf32>
    %cst_61 = arith.constant 0.166666672 : f32
    %93 = vector.broadcast %cst_61 : f32 to vector<256x16xf32>
    %94 = arith.mulf %92, %93 : vector<256x16xf32>
    %95 = arith.mulf %86, %94 : vector<256x16xf32>
    %cst_62 = arith.constant dense<0.000000e+00> : vector<16xf32>
    %96 = vector.multi_reduction <add>, %95, %cst_62 [0] : vector<256x16xf32> to vector<16xf32>
    %97 = vector.shape_cast %96 : vector<16xf32> to vector<1x16xf32>
    %cst_63 = arith.constant 3.906250e-03 : f32
    %98 = vector.broadcast %cst_63 : f32 to vector<1x16xf32>
    %99 = arith.mulf %97, %98 : vector<1x16xf32>
    %c0_64 = arith.constant 0 : index
    %c0_65 = arith.constant 0 : index
    %100 = vector.load %arg6[%c0_64, %c0_65] : memref<16x8xf32, #tpu.memory_space<vmem>>, vector<16x8xf32>
    %cst_66 = arith.constant dense<0.000000e+00> : vector<1x8xf32>
    %101 = tpu.matmul %99, %100, %cst_66 {dimension_numbers = #tpu.dot_dimension_numbers<[1], [0], [0], [1], [0, 0, 1, 1], [], []>} : vector<1x16xf32>, vector<16x8xf32>, vector<1x8xf32> -> vector<1x8xf32>
    %c0_67 = arith.constant 0 : index
    %c0_68 = arith.constant 0 : index
    %102 = vector.load %arg7[%c0_67, %c0_68] : memref<1x8xf32, #tpu.memory_space<vmem>>, vector<1x8xf32>
    %103 = arith.addf %101, %102 : vector<1x8xf32>
    %cst_69 = arith.constant 0.000000e+00 : f32
    %104 = vector.broadcast %cst_69 : f32 to vector<1x8xf32>
    %105 = arith.maximumf %103, %104 : vector<1x8xf32>
    %c0_70 = arith.constant 0 : index
    %c0_71 = arith.constant 0 : index
    %106 = vector.load %arg8[%c0_70, %c0_71] : memref<8x16xf32, #tpu.memory_space<vmem>>, vector<8x16xf32>
    %cst_72 = arith.constant dense<0.000000e+00> : vector<1x16xf32>
    %107 = tpu.matmul %105, %106, %cst_72 {dimension_numbers = #tpu.dot_dimension_numbers<[1], [0], [0], [1], [0, 0, 1, 1], [], []>} : vector<1x8xf32>, vector<8x16xf32>, vector<1x16xf32> -> vector<1x16xf32>
    %c0_73 = arith.constant 0 : index
    %c0_74 = arith.constant 0 : index
    %108 = vector.load %arg9[%c0_73, %c0_74] : memref<1x16xf32, #tpu.memory_space<vmem>>, vector<1x16xf32>
    %109 = arith.addf %107, %108 : vector<1x16xf32>
    %cst_75 = arith.constant 3.000000e+00 : f32
    %110 = vector.broadcast %cst_75 : f32 to vector<1x16xf32>
    %111 = arith.addf %109, %110 : vector<1x16xf32>
    %cst_76 = arith.constant 0.000000e+00 : f32
    %cst_77 = arith.constant 6.000000e+00 : f32
    %112 = vector.broadcast %cst_76 : f32 to vector<1x16xf32>
    %113 = arith.maximumf %112, %111 : vector<1x16xf32>
    %114 = vector.broadcast %cst_77 : f32 to vector<1x16xf32>
    %115 = arith.minimumf %114, %113 : vector<1x16xf32>
    %cst_78 = arith.constant 0.166666672 : f32
    %116 = vector.broadcast %cst_78 : f32 to vector<1x16xf32>
    %117 = arith.mulf %115, %116 : vector<1x16xf32>
    %118 = vector.broadcast %117 : vector<1x16xf32> to vector<256x16xf32>
    %119 = arith.mulf %95, %118 : vector<256x16xf32>
    %c0_79 = arith.constant 0 : index
    %c0_80 = arith.constant 0 : index
    %120 = vector.load %arg10[%c0_79, %c0_80] : memref<16x16xf32, #tpu.memory_space<vmem>>, vector<16x16xf32>
    %cst_81 = arith.constant dense<0.000000e+00> : vector<256x16xf32>
    %121 = tpu.matmul %119, %120, %cst_81 {dimension_numbers = #tpu.dot_dimension_numbers<[1], [0], [0], [1], [0, 0, 1, 1], [], []>} : vector<256x16xf32>, vector<16x16xf32>, vector<256x16xf32> -> vector<256x16xf32>
    %c0_82 = arith.constant 0 : index
    %c0_83 = arith.constant 0 : index
    %122 = vector.load %arg11[%c0_82, %c0_83] : memref<1x16xf32, #tpu.memory_space<vmem>>, vector<1x16xf32>
    %123 = vector.broadcast %122 : vector<1x16xf32> to vector<256x16xf32>
    %124 = arith.addf %121, %123 : vector<256x16xf32>
    %125 = tpu.transpose %124, [1, 0] : vector<256x16xf32> -> vector<16x256xf32>
    %c0_84 = arith.constant 0 : index
    %c0_85 = arith.constant 0 : index
    %c0_86 = arith.constant 0 : index
    %126 = vector.load %arg12[%c0_84, %c0_85, %c0_86] : memref<1x16x256xf32, #tpu.memory_space<vmem>>, vector<1x16x256xf32>
    %127 = vector.shape_cast %126 : vector<1x16x256xf32> to vector<16x256xf32>
    %128 = vector.shape_cast %125 : vector<16x256xf32> to vector<1x16x256xf32>
    tpu.vector_store %arg12[%c0_84, %c0_85, %c0_86], %128 {strides = array<i32>} : memref<1x16x256xf32, #tpu.memory_space<vmem>>, vector<1x16x256xf32>,
    return
  }
  func.func @transform_0(%arg0: i32) -> (i32, i32, i32) {
    %c0_i32 = arith.constant 0 : i32
    %c0_i32_0 = arith.constant 0 : i32
    %c0_i32_1 = arith.constant 0 : i32
    return %arg0, %c0_i32, %c0_i32_0 : i32, i32, i32
  }
  func.func @transform_1(%arg0: i32) -> (i32, i32) {
    %c0_i32 = arith.constant 0 : i32
    %c0_i32_0 = arith.constant 0 : i32
    %c0_i32_1 = arith.constant 0 : i32
    return %c0_i32, %c0_i32_0 : i32, i32
  }
  func.func @transform_2(%arg0: i32) -> (i32, i32) {
    %c0_i32 = arith.constant 0 : i32
    %c0_i32_0 = arith.constant 0 : i32
    %c0_i32_1 = arith.constant 0 : i32
    return %c0_i32, %c0_i32_0 : i32, i32
  }
  func.func @transform_3(%arg0: i32) -> (i32, i32) {
    %c0_i32 = arith.constant 0 : i32
    %c0_i32_0 = arith.constant 0 : i32
    %c0_i32_1 = arith.constant 0 : i32
    return %c0_i32, %c0_i32_0 : i32, i32
  }
  func.func @transform_4(%arg0: i32) -> (i32, i32) {
    %c0_i32 = arith.constant 0 : i32
    %c0_i32_0 = arith.constant 0 : i32
    %c0_i32_1 = arith.constant 0 : i32
    return %c0_i32, %c0_i32_0 : i32, i32
  }
  func.func @transform_5(%arg0: i32) -> (i32, i32) {
    %c0_i32 = arith.constant 0 : i32
    %c0_i32_0 = arith.constant 0 : i32
    %c0_i32_1 = arith.constant 0 : i32
    return %c0_i32, %c0_i32_0 : i32, i32
  }
  func.func @transform_6(%arg0: i32) -> (i32, i32) {
    %c0_i32 = arith.constant 0 : i32
    %c0_i32_0 = arith.constant 0 : i32
    %c0_i32_1 = arith.constant 0 : i32
    return %c0_i32, %c0_i32_0 : i32, i32
  }
  func.func @transform_7(%arg0: i32) -> (i32, i32) {
    %c0_i32 = arith.constant 0 : i32
    %c0_i32_0 = arith.constant 0 : i32
    %c0_i32_1 = arith.constant 0 : i32
    return %c0_i32, %c0_i32_0 : i32, i32
  }
  func.func @transform_8(%arg0: i32) -> (i32, i32) {
    %c0_i32 = arith.constant 0 : i32
    %c0_i32_0 = arith.constant 0 : i32
    %c0_i32_1 = arith.constant 0 : i32
    return %c0_i32, %c0_i32_0 : i32, i32
  }
  func.func @transform_9(%arg0: i32) -> (i32, i32) {
    %c0_i32 = arith.constant 0 : i32
    %c0_i32_0 = arith.constant 0 : i32
    %c0_i32_1 = arith.constant 0 : i32
    return %c0_i32, %c0_i32_0 : i32, i32
  }
  func.func @transform_10(%arg0: i32) -> (i32, i32) {
    %c0_i32 = arith.constant 0 : i32
    %c0_i32_0 = arith.constant 0 : i32
    %c0_i32_1 = arith.constant 0 : i32
    return %c0_i32, %c0_i32_0 : i32, i32
  }
  func.func @transform_11(%arg0: i32) -> (i32, i32, i32) {
    %c0_i32 = arith.constant 0 : i32
    %c0_i32_0 = arith.constant 0 : i32
    %c0_i32_1 = arith.constant 0 : i32
    return %arg0, %c0_i32, %c0_i32_0 : i32, i32, i32
  }
}

</mosaic_0001>

<bundles_post_ra>
// kernel: tpu_custom_call.1
= control target key start
LH: loop header
LB: loop body
LE: loop exit
PB: predicated region body
PF: predicated region fallthrough
CT: control target
= control target key end

     0   :  { %s4637_s0 = inlined_call_operand.hbm [shape: f32[2,8,256], index: 0, kind: input, shape index: {}]   ;;  %s4638_s1 = inlined_call_operand.hbm [shape: f32[8,16], index: 1, kind: input, shape index: {}]   ;;  %s4639_s2 = inlined_call_operand.hbm [shape: f32[1,16], index: 2, kind: input, shape index: {}]   ;;  %s4640_s3 = inlined_call_operand.vmem [shape: f32[9,16], index: 3, kind: input, shape index: {}]   ;;  %s4641_s4 = inlined_call_operand.hbm [shape: f32[1,16], index: 4, kind: input, shape index: {}]   ;;  %s4642_s5 = inlined_call_operand.vmem [shape: f32[16,8], index: 5, kind: input, shape index: {}]   ;;  %s4643_s6 = inlined_call_operand.hbm [shape: f32[1,8], index: 6, kind: input, shape index: {}]   ;;  %s4644_s7 = inlined_call_operand.hbm [shape: f32[8,16], index: 7, kind: input, shape index: {}]   ;;  %s4645_s8 = inlined_call_operand.hbm [shape: f32[1,16], index: 8, kind: input, shape index: {}]   ;;  %s4646_s9 = inlined_call_operand.vmem [shape: f32[16,16], index: 9, kind: input, shape index: {}]   ;;  %s4647_s10 = inlined_call_operand.vmem [shape: f32[1,16], index: 10, kind: input, shape index: {}]   ;;  %s4648_s11 = inlined_call_operand.hbm [shape: f32[2,16,256], index: 11, kind: output, shape index: {}]  }
   0x1   :  { %4670 = sst [smem:[#allocation42_spill]] %s4638_s1 }
   0x2   :  { %4671 = sst [smem:[#allocation43_spill]] %s4639_s2 }
   0x3   :  { %4672 = sst [smem:[#allocation44_spill]] %s4641_s4 }
   0x4   :  { %4673 = sst [smem:[#allocation45_spill]] %s4643_s6 }
   0x5   :  { %4674 = sst [smem:[#allocation46_spill]] %s4644_s7 }
   0x6   :  { %4675 = sst [smem:[#allocation47_spill]] %s4645_s8 }
   0x7   :  { %16 = vsyncpa [#allocation4], 0 }
   0x8   :  { %18 = vsyncpa [#allocation4 + $0x1], 0 }
   0x9   :  { %19 = vsyncpa [#allocation7], 0 }
   0xa   :  { %20 = vsyncpa [#allocation10], 0 }
   0xb   :  { %21 = vsyncpa [#allocation13], 0 }
   0xc   :  { %22 = vsyncpa [#allocation5], 0 }
   0xd   :  { %24 = vsyncpa [#allocation5 + $0x1], 0  ;;  %s3239_s17 = smov 0   ;;  %s3241_s18 = smov 0  }
   0xe   :  { %s3243_s19 = smov 0   ;;  %s3245_s20 = smov 0  }
   0xf LB: > { %s4676_s1 = sld [smem:[#allocation42_spill]]  ;;  %s3263_s24 = sadd.s32 4294967295, %s3168_s20   ;;  %s3168_s20 = sphi %s3245_s20, %s4737_s20   ;;  %s3164_s19 = sphi %s3243_s19, %s4736_s19   ;;  %s3160_s18 = sphi %s3241_s18, %s4735_s18   ;;  %s3156_s17 = sphi %s3239_s17, %s4734_s17  }
  0x10   : > { %p2669_p0 = scmp.ge.s32.totalorder %s3168_s20, 1  ;;  %p51_p1 = scmp.eq.s32.totalorder %s3263_s24, 0 }
  0x11   : > { %p297_p2 = scmp.lt.s32.totalorder %s3168_s20, 3  ;;  %s3170_s26 = smov [#allocation6]  }
  0x12   : > { %s311_s27 = sshll.u32 %s3170_s26, 4  ;;  %s4678_s4 = sld [smem:[#allocation44_spill]]  ;;  %s312_s27 = int_to_ptr.vmem [resolvable:$true] %s311_s27 }
  0x13   : > { %p3268_p3 = pnand %p2669_p0, %p297_p2  ;;  %s3171_s13 = smov [#allocation9]  }
  0x14   : > { %s338_s14 = sshll.u32 %s3171_s13, 4  ;;  %s4680_s7 = sld [smem:[#allocation46_spill]]  ;;  %s339_s14 = int_to_ptr.vmem [resolvable:$true] %s338_s14 }
  0x15   : > { %s309_s23 = sshll.u32 %s4676_s1, 4  ;;  %p2793_p5 = pneg %p3268_p3  ;;  %s310_s23 = int_to_ptr.hbm [resolvable:$true] %s309_s23 }
  0x16   : > { %s4681_s2 = sld [smem:[#allocation43_spill]]  ;;  %s3172_s29 = smov [#allocation12]  }
  0x17   : > { %p3280_p6 = pnand %p2793_p5, %p51_p1  ;;  %s365_s1 = sshll.u32 %s3172_s29, 4  ;;  %s366_s1 = int_to_ptr.vmem [resolvable:$true] %s365_s1 }
  0x18   : > { %s336_s30 = sshll.u32 %s4678_s4, 4  ;;  %s3173_s13 = smov [#allocation8]   ;;  %s337_s30 = int_to_ptr.hbm [resolvable:$true] %s336_s30 }
  0x19   : > { %2796 = dma.hbm_to_vmem [thread:$0]  (!%p3280_p6), %s310_s23, 128, %s312_s27, [#allocation7]  }
  0x1a   : > { %s363_s21 = sshll.u32 %s4680_s7, 4  ;;  %s323_s15 = sshll.u32 %s3173_s13, 4  ;;  %s364_s21 = int_to_ptr.hbm [resolvable:$true] %s363_s21  ;;  %s324_s15 = int_to_ptr.vmem [resolvable:$true] %s323_s15 }
  0x1b   : > { %2802 = dma.hbm_to_vmem [thread:$0]  (!%p3280_p6), %s337_s30, 16, %s339_s14, [#allocation10]  }
  0x1c   : > { %s321_s28 = sshll.u32 %s4681_s2, 4  ;;  %s4682_s6 = sld [smem:[#allocation45_spill]]  ;;  %s322_s28 = int_to_ptr.hbm [resolvable:$true] %s321_s28 }
  0x1d   : > { %2808 = dma.hbm_to_vmem [thread:$0]  (!%p3280_p6), %s364_s21, 128, %s366_s1, [#allocation13]  }
  0x1e   : > { %2799 = dma.hbm_to_vmem [thread:$0]  (!%p3280_p6), %s322_s28, 16, %s324_s15, [#allocation7]  }
  0x1f   : > { %s4683_s8 = sld [smem:[#allocation47_spill]]  ;;  %s3174_s14 = smov [#allocation11]  }
  0x20   : > { %s353_s21 = sshll.u32 %s3174_s14, 4  ;;  %s3175_s4 = smov [#allocation14]   ;;  %s354_s21 = int_to_ptr.vmem [resolvable:$true] %s353_s21 }
  0x21   : > { %s377_s22 = sshll.u32 %s3175_s4, 4  ;;  %s2668_s26 = sadd.s32 4294967294, %s3168_s20   ;;  %s378_s22 = int_to_ptr.vmem [resolvable:$true] %s377_s22 }
  0x22   : > { %s351_s23 = sshll.u32 %s4682_s6, 4  ;;  %s3310_s28 = sadd.s32 1, %s3168_s20   ;;  %s352_s23 = int_to_ptr.hbm [resolvable:$true] %s351_s23 }
  0x23   : > { %2805 = dma.hbm_to_vmem [thread:$0]  (!%p3280_p6), %s352_s23, 16, %s354_s21, [#allocation10]  }
  0x24   : > { %s34_s29 = ssub.s32 %s3168_s20, %s3310_s28  ;;  %s37_s13 = sadd.s32 1, %s3164_s19 }
  0x25   : > { %s375_s1 = sshll.u32 %s4683_s8, 4  ;;  %p35_p7 = scmp.eq.s32.totalorder %s34_s29, 0  ;;  %s376_s1 = int_to_ptr.hbm [resolvable:$true] %s375_s1 }
  0x26   : > { %2811 = dma.hbm_to_vmem [thread:$0]  (!%p3280_p6), %s376_s1, 16, %s378_s22, [#allocation13]  }
  0x27   : > { %p44_p8 = scmp.ne.s32.totalorder %s3164_s19, %s3160_s18  ;;  %p45_p9 = scmp.eq.s32.totalorder %s3168_s20, 0 }
  0x28   : > { %p50_p10 = scmp.ne.s32.totalorder %s3160_s18, %s3156_s17  ;;  %p284_p13 = scmp.eq.s32.totalorder %s3263_s24, 1 }
  0x29   : > { %s3321_s15 = scalar_select %p35_p7, %s3164_s19, %s37_s13  }
  0x2a   : > { %p3323_p11 = por %p45_p9, %p44_p8  ;;  %p3329_p12 = por %p51_p1, %p50_p10 }
  0x2b   : > { %p290_p0 = scmp.eq.s32.totalorder %s2668_s26, 1  ;;  %p2826_p2 = scmp.lt.s32.totalorder %s3168_s20, 2 }
  0x2c   : > { %s394_s23 = sand.u32 1, %s3164_s19   ;;  %p3336_p5 = por %p284_p13, %p44_p8 }
  0x2d   : > { %p3340_p6 = por %p290_p0, %p50_p10  ;;  %s2677_s1 = sshll.u32 %s394_s23, 4 }
  0x2e   : > { %s2760_s14 = sshll.u32 %s3168_s20, 4  ;;  %s398_s29 = scalar_lea.vmem [#allocation3], %s2677_s1 }
  0x2f   : > { %s403_s22 = scalar_lea.hbm %s4637_s0, %s2760_s14  ;;  %s407_s13 = sshll.u32 %s398_s29, 4  ;;  %s408_s13 = int_to_ptr.vmem [resolvable:$true] %s407_s13 }
  0x30   : > { %s405_s2 = sshll.u32 %s403_s22, 4  ;;  %p3350_p7 = pnand %p2826_p2, %p3323_p11  ;;  %s406_s2 = int_to_ptr.hbm [resolvable:$true] %s405_s2 }
  0x31   : > { %s395_s6 = scalar_lea.sflag [#allocation4], %s394_s23  ;;  %s3060_s7 = sshra.s32 %s406_s2, 4  ;;  %s3061_s7 = int_to_ptr.hbm [resolvable:$true] %s3060_s7 }
  0x32   : > { %s3062_s8 = scalar_lea.hbm %s3061_s7, 16  ;;  %p3064_p9 = pneg %p3350_p7 }
  0x33   : > { %p3063_p8 = scmp.ne.s32.totalorder %s3061_s7, %s3062_s8  ;;  %s3067_s21 = scalar_lea.hbm %s4637_s0, 32 }
  0x34   : > { %p3068_p11 = scmp.lt.s32.totalorder %s3061_s7, %s4637_s0  ;;  %p3069_p0 = scmp.lt.s32.totalorder %s3067_s21, %s3062_s8 }
  0x35   : > { %p3065_p10 = pnand %p3064_p9, %p3063_p8 }
  0x36   : > { %p3070_p2 = por %p3069_p0, %p3068_p11 }
  0x37   : > { %p3066_p13 = pneg %p3065_p10 }
  0x39   : > { %p3071_p4 = pnand %p3070_p2, %p3066_p13 }
  0x3b   : > { %3074 = shalt.err (!%p3071_p4)
}
  0x3c   : > { %2815 = dma.hbm_to_vmem [thread:$0]  (!%p3350_p7), %s406_s2, 256, %s408_s13, %s395_s6  }
  0x3d   : > { %416 = sbr.rel (%p3268_p3) target bundleno = 1286 (0x506), region = 64 }
  0x42   : > { %s3367_s23 = sand.u32 1, %s3160_s18  }
  0x43   : > { %s2681_s22 = sshll.u32 %s3367_s23, 4  ;;  %s419_s29 = scalar_lea.sflag [#allocation4], %s3367_s23 }
  0x44   : > { %s422_s1 = scalar_lea.vmem [#allocation3], %s2681_s22 }
  0x45   : > { %3135 = dma.done.wait (%p3329_p12), %s419_s29, 256  }
  0x46   : > { %3137 = vsyncadd (%p3329_p12), %s419_s29, 4294967040 }
  0x47   : > { %3139 = dma.done.wait (%p51_p1), [#allocation7], 144  }
  0x48   : > { %3141 = vsyncadd (%p51_p1), [#allocation7], 4294967152 }
  0x49   : > { %3143 = dma.done.wait (%p51_p1), [#allocation10], 32  }
  0x4a   : > { %3145 = vsyncadd (%p51_p1), [#allocation10], 4294967264 }
  0x4b   : > { %3147 = dma.done.wait (%p51_p1), [#allocation13], 144  }
  0x4c   : > { %3149 = vsyncadd (%p51_p1), [#allocation13], 4294967152  ;;  %v537_v0 = vld [vmem:[%s422_s1] sm:$0xff]  ;;  %v538_v2 = vld [vmem:[%s422_s1 + $0x8] sm:$0xff]  ;;  %vm608_vm0 = vcmask 64512   ;;  %vm492_vm1 = vcmask 130048  }
  0x4d   : > { %539 = vxpose.xlu0.b32.start.end [1/1] (short) %v537_v0, 128  ;;  %v603_v1 = vld [vmem:[#allocation6] sm:$0xff]  ;;  %vm502_vm2 = vcmask 122880   ;;  %v3176_v15 = vmov 0.0   ;;  %v3436_v20 = vld [vmem:[#allocation8] ss:$0 sm:$0xff]  ;;  %vm495_vm3 = vcmask 123904  }
  0x4e   : > { %720 = vmatpush.msra.mxu0 %v603_v1  ;;  %2762 = vmatpush.msra.mxu1 %v603_v1  ;;  %493 = vst.msk [vmem:[#allocation2] sm:$0xff] %vm492_vm1, %v3176_v15  ;;  %v3461_v1 = vld [vmem:[%s4640_s3] sm:$0xff]  ;;  %s2688_s1 = sshll.u32 %s3367_s23, 5  ;;  %s2761_s6 = sshll.u32 %s3263_s24, 5 }
  0x4f   : > { %494 = vst.msk [vmem:[#allocation2 + $0x8] sm:$0xff] %vm492_vm1, %v3176_v15  ;;  %s491_s2 = scalar_lea.vmem [#allocation15], %s2688_s1  ;;  %s2534_s25 = scalar_lea.hbm %s4648_s11, %s2761_s6 }
  0x50   : > { %503 = vst.msk [vmem:[#allocation2 + $0x18] sm:$0x1] %vm502_vm2, %v3176_v15  ;;  %s2535_s12 = sshll.u32 %s491_s2, 4  ;;  %s2537_s13 = sshll.u32 %s2534_s25, 4  ;;  %s2536_s12 = int_to_ptr.vmem [resolvable:$true] %s2535_s12  ;;  %s2538_s13 = int_to_ptr.hbm [resolvable:$true] %s2537_s13 }
  0x51   : > { %498 = vst.msk [vmem:[#allocation2 + $0x198] sm:$0xff] %vm492_vm1, %v3176_v15  ;;  %s2523_s26 = scalar_lea.sflag [#allocation5], %s3367_s23  ;;  %s3104_s14 = sshra.s32 %s2538_s13, 4  ;;  %s3105_s14 = int_to_ptr.hbm [resolvable:$true] %s3104_s14 }
  0x52   : > { %499 = vst.msk [vmem:[#allocation2 + $0x1a0] sm:$0xff] %vm492_vm1, %v3176_v15  ;;  %s3106_s21 = scalar_lea.hbm %s3105_s14, 32  ;;  %s3110_s16 = scalar_lea.hbm %s4648_s11, 64 }
  0x53   : > { %504 = vst.msk [vmem:[#allocation2 + $0x30] sm:$0x1] %vm502_vm2, %v3176_v15  ;;  %p3107_p1 = scmp.ne.s32.totalorder %s3105_s14, %s3106_s21  ;;  %p3111_p12 = scmp.lt.s32.totalorder %s3105_s14, %s4648_s11 }
  0x54   : > { %505 = vst.msk [vmem:[#allocation2 + $0x48] sm:$0x1] %vm502_vm2, %v3176_v15  ;;  %p3112_p7 = scmp.lt.s32.totalorder %s3110_s16, %s3106_s21 }
  0x55   : > { %506 = vst.msk [vmem:[#allocation2 + $0x60] sm:$0x1] %vm502_vm2, %v3176_v15  ;;  %p3108_p3 = pnand %p3107_p1, %p3336_p5 }
  0x56   : > { %507 = vst.msk [vmem:[#allocation2 + $0x78] sm:$0x1] %vm502_vm2, %v3176_v15  ;;  %p3113_p8 = por %p3112_p7, %p3111_p12 }
  0x57   : > { %508 = vst.msk [vmem:[#allocation2 + $0x90] sm:$0x1] %vm502_vm2, %v3176_v15  ;;  %p3109_p4 = pneg %p3108_p3 }
  0x58   : > { %509 = vst.msk [vmem:[#allocation2 + $0xa8] sm:$0x1] %vm502_vm2, %v3176_v15 }
  0x59   : > { %510 = vst.msk [vmem:[#allocation2 + $0xc0] sm:$0x1] %vm502_vm2, %v3176_v15  ;;  %p3114_p9 = pnand %p3113_p8, %p3109_p4 }
  0x5a   : > { %511 = vst.msk [vmem:[#allocation2 + $0xd8] sm:$0x1] %vm502_vm2, %v3176_v15 }
  0x5b   : > { %512 = vst.msk [vmem:[#allocation2 + $0xf0] sm:$0x1] %vm502_vm2, %v3176_v15 }
  0x5c   : > { %513 = vst.msk [vmem:[#allocation2 + $0x108] sm:$0x1] %vm502_vm2, %v3176_v15 }
  0x5d   : > { %514 = vst.msk [vmem:[#allocation2 + $0x120] sm:$0x1] %vm502_vm2, %v3176_v15 }
  0x5e   : > { %515 = vst.msk [vmem:[#allocation2 + $0x138] sm:$0x1] %vm502_vm2, %v3176_v15 }
  0x5f   : > { %516 = vst.msk [vmem:[#allocation2 + $0x150] sm:$0x1] %vm502_vm2, %v3176_v15 }
  0x60   : > { %517 = vst.msk [vmem:[#allocation2 + $0x168] sm:$0x1] %vm502_vm2, %v3176_v15 }
  0x61   : > { %518 = vst.msk [vmem:[#allocation2 + $0x180] sm:$0x1] %vm502_vm2, %v3176_v15 }
  0x62   : > { %519 = vst.msk [vmem:[#allocation2 + $0x29] sm:$0x1] %vm502_vm2, %v3176_v15 }
  0x63   : > { %520 = vst.msk [vmem:[#allocation2 + $0x41] sm:$0x1] %vm502_vm2, %v3176_v15 }
  0x64   : > { %521 = vst.msk [vmem:[#allocation2 + $0x59] sm:$0x1] %vm502_vm2, %v3176_v15 }
  0x65   : > { %522 = vst.msk [vmem:[#allocation2 + $0x71] sm:$0x1] %vm502_vm2, %v3176_v15 }
  0x66   : > { %523 = vst.msk [vmem:[#allocation2 + $0x89] sm:$0x1] %vm502_vm2, %v3176_v15 }
  0x67   : > { %524 = vst.msk [vmem:[#allocation2 + $0xa1] sm:$0x1] %vm502_vm2, %v3176_v15 }
  0x68   : > { %525 = vst.msk [vmem:[#allocation2 + $0xb9] sm:$0x1] %vm502_vm2, %v3176_v15 }
  0x69   : > { %526 = vst.msk [vmem:[#allocation2 + $0xd1] sm:$0x1] %vm502_vm2, %v3176_v15 }
  0x6a   : > { %527 = vst.msk [vmem:[#allocation2 + $0xe9] sm:$0x1] %vm502_vm2, %v3176_v15 }
  0x6b   : > { %528 = vst.msk [vmem:[#allocation2 + $0x101] sm:$0x1] %vm502_vm2, %v3176_v15 }
  0x6c   : > { %529 = vst.msk [vmem:[#allocation2 + $0x119] sm:$0x1] %vm502_vm2, %v3176_v15 }
  0x6d   : > { %530 = vst.msk [vmem:[#allocation2 + $0x131] sm:$0x1] %vm502_vm2, %v3176_v15 }
  0x6e   : > { %531 = vst.msk [vmem:[#allocation2 + $0x149] sm:$0x1] %vm502_vm2, %v3176_v15 }
  0x6f   : > { %532 = vst.msk [vmem:[#allocation2 + $0x161] sm:$0x1] %vm502_vm2, %v3176_v15 }
  0x70   : > { %533 = vst.msk [vmem:[#allocation2 + $0x179] sm:$0x1] %vm502_vm2, %v3176_v15 }
  0x71   : > { %534 = vst.msk [vmem:[#allocation2 + $0x191] sm:$0x1] %vm502_vm2, %v3176_v15 }
  0x72   : > { %496 = vst.msk [vmem:[#allocation2 + $0x10] sm:$0x3] %vm495_vm3, %v3176_v15 }
  0x73   : > { %500 = vst.msk [vmem:[#allocation2 + $0x1a8] sm:$0x3] %vm495_vm3, %v3176_v15 }
  0xcd   : > { %571 = vxpose.xlu0.b32.start.end [1/1] (short) %v538_v2, 128 }
  0xf1   : > { %v555_v3 = vpop.trf.xlu0 }
  0xf2   : > { %2689 = vmatmul.msk.f32.vlgmr.msra.gmra.mxu0 %vm608_vm0, %v555_v3  ;;  %v1011_v3 = vld [vmem:[#allocation2 + $0x8] sm:$0xff] }
  0xf9   : > { %v556_v4 = vpop.trf.xlu0 }
  0xfa   : > { %2690 = vmatmul.msk.f32.gmra.mxu0 %vm608_vm0, %v556_v4  ;;  %v1108_v4 = vld [vmem:[#allocation2 + $0x9] sm:$0xff] }
 0x101   : > { %v557_v5 = vpop.trf.xlu0 }
 0x102   : > { %2691 = vmatmul.msk.f32.gmra.mxu0 %vm608_vm0, %v557_v5 }
 0x109   : > { %v558_v6 = vpop.trf.xlu0 }
 0x10a   : > { %2692 = vmatmul.msk.f32.gmra.mxu0 %vm608_vm0, %v558_v6  ;;  %v3464_v6 = vperm.slane %v3461_v1, 0 }
 0x111   : > { %v559_v7 = vpop.trf.xlu0 }
 0x112   : > { %2693 = vmatmul.msk.f32.gmra.mxu0 %vm608_vm0, %v559_v7  ;;  %v3467_v7 = vperm.slane %v3461_v1, 1 }
 0x119   : > { %v560_v8 = vpop.trf.xlu0 }
 0x11a   : > { %2694 = vmatmul.msk.f32.gmra.mxu0 %vm608_vm0, %v560_v8 }
 0x121   : > { %v561_v9 = vpop.trf.xlu0 }
 0x122   : > { %2695 = vmatmul.msk.f32.gmra.mxu0 %vm608_vm0, %v561_v9  ;;  %v1010_v9 = vld [vmem:[#allocation2] sm:$0xff] }
 0x129   : > { %v562_v10 = vpop.trf.xlu0 }
 0x12a   : > { %2696 = vmatmul.msk.f32.gmra.mxu0 %vm608_vm0, %v562_v10  ;;  %v1107_v10 = vld [vmem:[#allocation2 + $0x1] sm:$0xff] }
 0x131   : > { %v563_v11 = vpop.trf.xlu0 }
 0x132   : > { %2697 = vmatmul.msk.f32.gmra.mxu0 %vm608_vm0, %v563_v11  ;;  %v1044_v11 = vmul.f32 %v3464_v6, %v1011_v3  ;;  %v536_v3 = vld [vmem:[%s4640_s3 + $0x8] sm:$0x1] }
 0x139   : > { %v564_v12 = vpop.trf.xlu0 }
 0x13a   : > { %2698 = vmatmul.msk.f32.gmra.mxu0 %vm608_vm0, %v564_v12  ;;  %v1141_v12 = vmul.f32 %v3467_v7, %v1108_v4 }
 0x141   : > { %v565_v13 = vpop.trf.xlu0 }
 0x142   : > { %2699 = vmatmul.msk.f32.gmra.mxu0 %vm608_vm0, %v565_v13 }
 0x149   : > { %v566_v14 = vpop.trf.xlu0 }
 0x14a   : > { %2700 = vmatmul.msk.f32.gmra.mxu0 %vm608_vm0, %v566_v14  ;;  %v1205_v14 = vld [vmem:[#allocation2 + $0xa] sm:$0xff] }
 0x151   : > { %v567_v16 = vpop.trf.xlu0 }
 0x152   : > { %2701 = vmatmul.msk.f32.gmra.mxu0 %vm608_vm0, %v567_v16  ;;  %v3474_v16 = vperm.slane %v3461_v1, 2 }
 0x159   : > { %v568_v17 = vpop.trf.xlu0 }
 0x15a   : > { %2702 = vmatmul.msk.f32.gmra.mxu0 %vm608_vm0, %v568_v17  ;;  %v1043_v17 = vmul.f32 %v3464_v6, %v1010_v9 }
 0x161   : > { %v569_v18 = vpop.trf.xlu0 }
 0x162   : > { %2703 = vmatmul.msk.f32.gmra.mxu0 %vm608_vm0, %v569_v18  ;;  %v1140_v18 = vmul.f32 %v3467_v7, %v1107_v10 }
 0x169   : > { %v570_v19 = vpop.trf.xlu0 }
 0x16a   : > { %2704 = vmatmul.msk.f32.gmra.mxu0 %vm608_vm0, %v570_v19  ;;  %v1204_v19 = vld [vmem:[#allocation2 + $0x2] sm:$0xff] }
 0x16f   : > { %v722_v21 = vpop.f32.mrf.mxu0 }
 0x170   : > { %v723_v22 = vadd.f32 %v3436_v20, %v722_v21  ;;  %v1173_v21 = vadd.f32 %v1141_v12, %v1044_v11 }
 0x171   : > { %v587_v23 = vpop.trf.xlu0 }
 0x172   : > { %v818_v24 = vadd.f32 3.0, %v723_v22  ;;  %2705 = vmatmul.msk.f32.gmra.mxu0 %vm608_vm0, %v587_v23 }
 0x174   : > { %v850_v25 = vmax.f32 %v818_v24, 0.0 }
 0x176   : > { %v882_v26 = vmin.f32 %v850_v25, 6.0 }
 0x177   : > { %v725_v27 = vpop.f32.mrf.mxu0 }
 0x178   : > { %v914_v28 = vmul.f32 0.16666667, %v882_v26  ;;  %v726_v29 = vadd.f32 %v3436_v20, %v725_v27  ;;  %v3480_v27 = vperm.slane %v3461_v1, 3 }
 0x179   : > { %v588_v30 = vpop.trf.xlu0 }
 0x17a   : > { %v946_v31 = vmul.f32 %v914_v28, %v723_v22  ;;  %v819_v32 = vadd.f32 3.0, %v726_v29  ;;  %2706 = vmatmul.msk.f32.vlgmr.msra.gmra.mxu1 %vm608_vm0, %v588_v30  ;;  %v1238_v22 = vmul.f32 %v3474_v16, %v1205_v14  ;;  %v1172_v30 = vadd.f32 %v1140_v18, %v1043_v17 }
 0x17b   : > { %v3523_v18 = vperm.slane %v536_v3, 0 }
 0x17c   : > { %978 = vst.msk [vmem:[#allocation2 + $0x19] sm:$0xff] %vm492_vm1, %v946_v31  ;;  %v851_v33 = vmax.f32 %v819_v32, 0.0  ;;  %v1237_v31 = vmul.f32 %v3474_v16, %v1204_v19 }
 0x17e   : > { %v883_v34 = vmin.f32 %v851_v33, 6.0 }
 0x17f   : > { %v728_v35 = vpop.f32.mrf.mxu0 }
 0x180   : > { %v915_v36 = vmul.f32 0.16666667, %v883_v34  ;;  %v729_v37 = vadd.f32 %v3436_v20, %v728_v35  ;;  %v1270_v35 = vadd.f32 %v1238_v22, %v1173_v21 }
 0x181   : > { %v589_v38 = vpop.trf.xlu0 }
 0x182   : > { %v947_v39 = vmul.f32 %v915_v36, %v726_v29  ;;  %v820_v40 = vadd.f32 3.0, %v729_v37  ;;  %2707 = vmatmul.msk.f32.gmra.mxu1 %vm608_vm0, %v589_v38 }
 0x183   : > { %v1012_v34 = vld [vmem:[#allocation2 + $0x18] sm:$0xff] }
 0x184   : > { %979 = vst.msk [vmem:[#allocation2 + $0x21] sm:$0xff] %vm492_vm1, %v947_v39  ;;  %v852_v41 = vmax.f32 %v820_v40, 0.0  ;;  %v1269_v40 = vadd.f32 %v1237_v31, %v1172_v30 }
 0x186   : > { %v884_v42 = vmin.f32 %v852_v41, 6.0  ;;  %v1334_v41 = vmul.f32 %v3480_v27, %v1012_v34 }
 0x187   : > { %v731_v43 = vpop.f32.mrf.mxu0 }
 0x188   : > { %v732_v44 = vadd.f32 %v3436_v20, %v731_v43  ;;  %v916_v45 = vmul.f32 0.16666667, %v884_v42 }
 0x189   : > { %v590_v46 = vpop.trf.xlu0 }
 0x18a   : > { %v821_v47 = vadd.f32 3.0, %v732_v44  ;;  %2708 = vmatmul.msk.f32.gmra.mxu1 %vm608_vm0, %v590_v46  ;;  %v948_v48 = vmul.f32 %v916_v45, %v729_v37  ;;  %v1109_v46 = vld [vmem:[#allocation2 + $0x19] sm:$0xff] }
 0x18b   : > { %v1013_v24 = vld [vmem:[#allocation2 + $0x20] sm:$0xff] }
 0x18c   : > { %980 = vst.msk [vmem:[#allocation2 + $0x31] sm:$0xff] %vm492_vm1, %v948_v48  ;;  %v853_v49 = vmax.f32 %v821_v47, 0.0  ;;  %v1335_v36 = vmul.f32 %v3480_v27, %v1013_v24  ;;  %v1110_v42 = vld [vmem:[#allocation2 + $0x21] sm:$0xff]  ;;  %v3492_v47 = vperm.slane %v3461_v1, 5 }
 0x18e   : > { %v885_v51 = vmin.f32 %v853_v49, 6.0  ;;  %v1367_v45 = vadd.f32 %v1335_v36, %v1270_v35 }
 0x18f   : > { %v734_v50 = vpop.f32.mrf.mxu0 }
 0x190   : > { %v735_v52 = vadd.f32 %v3436_v20, %v734_v50  ;;  %v917_v54 = vmul.f32 0.16666667, %v885_v51  ;;  %v1206_v51 = vld [vmem:[#allocation2 + $0x1a] sm:$0xff] }
 0x191   : > { %v591_v53 = vpop.trf.xlu0 }
 0x192   : > { %v822_v55 = vadd.f32 3.0, %v735_v52  ;;  %2709 = vmatmul.msk.f32.gmra.mxu1 %vm608_vm0, %v591_v53  ;;  %v949_v56 = vmul.f32 %v917_v54, %v732_v44  ;;  %v3489_v44 = vperm.slane %v3461_v1, 4  ;;  %v1045_v53 = vmul.f32 %v3464_v6, %v1012_v34 }
 0x193   : > { %v1366_v54 = vadd.f32 %v1334_v41, %v1269_v40 }
 0x194   : > { %v854_v57 = vmax.f32 %v822_v55, 0.0  ;;  %981 = vst.msk [vmem:[#allocation2 + $0x39] sm:$0xff] %vm492_vm1, %v949_v56  ;;  %v1207_v55 = vld [vmem:[#allocation2 + $0x22] sm:$0xff]  ;;  %v3497_v56 = vperm.slane %v3461_v1, 6 }
 0x195   : > { %v1529_v9 = vmul.f32 %v3492_v47, %v1207_v55 }
 0x196   : > { %v886_v58 = vmin.f32 %v854_v57, 6.0 }
 0x197   : > { %v737_v59 = vpop.f32.mrf.mxu0 }
 0x198   : > { %v918_v60 = vmul.f32 0.16666667, %v886_v58  ;;  %v738_v61 = vadd.f32 %v3436_v20, %v737_v59  ;;  %v1142_v59 = vmul.f32 %v3467_v7, %v1109_v46 }
 0x199   : > { %v592_v62 = vpop.trf.xlu0 }
 0x19a   : > { %v950_v63 = vmul.f32 %v918_v60, %v735_v52  ;;  %v823_v0 = vadd.f32 3.0, %v738_v61  ;;  %2710 = vmatmul.msk.f32.gmra.mxu1 %vm608_vm0, %v592_v62  ;;  %v1432_v52 = vmul.f32 %v3489_v44, %v1110_v42  ;;  %v1431_v60 = vmul.f32 %v3489_v44, %v1109_v46 }
 0x19b   : > { %v3499_v57 = vld [vmem:[#allocation2 + $0x38] sm:$0xff]  ;;  %v1174_v14 = vadd.f32 %v1142_v59, %v1045_v53 }
 0x19c   : > { %982 = vst.msk [vmem:[#allocation2 + $0x49] sm:$0xff] %vm492_vm1, %v950_v63  ;;  %v855_v2 = vmax.f32 %v823_v0, 0.0  ;;  %v1464_v62 = vadd.f32 %v1432_v52, %v1367_v45  ;;  %v1014_v63 = vld [vmem:[#allocation2 + $0x30] sm:$0xff]  ;;  %v1143_v0 = vmul.f32 %v3467_v7, %v1110_v42  ;;  %v1627_v10 = vmul.f32 %v3497_v56, %v3499_v57  ;;  %v1112_v22 = vld [vmem:[#allocation2 + $0x39] sm:$0xff] }
 0x19d   : > { %v1463_v11 = vadd.f32 %v1431_v60, %v1366_v54  ;;  %v1626_v12 = vmul.f32 %v3497_v56, %v1014_v63  ;;  %v1336_v17 = vmul.f32 %v3480_v27, %v1014_v63  ;;  %v1208_v30 = vld [vmem:[#allocation2 + $0x32] sm:$0xff]  ;;  %v1337_v34 = vmul.f32 %v3480_v27, %v3499_v57 }
 0x19e   : > { %v887_v13 = vmin.f32 %v855_v2, 6.0  ;;  %v1528_v2 = vmul.f32 %v3492_v47, %v1206_v51  ;;  %v1820_v40 = vmul.f32 %v3523_v18, %v1208_v30  ;;  %v1530_v45 = vmul.f32 %v3492_v47, %v1208_v30 }
 0x19f   : > { %v740_v5 = vpop.f32.mrf.mxu0  ;;  %v1434_v54 = vmul.f32 %v3489_v44, %v1112_v22 }
 0x1a0   : > { %v741_v15 = vadd.f32 %v3436_v20, %v740_v5  ;;  %v919_v23 = vmul.f32 0.16666667, %v887_v13  ;;  %v3520_v13 = vperm.slane %v3461_v1, 7  ;;  %v1560_v21 = vadd.f32 %v1528_v2, %v1463_v11 }
 0x1a1   : > { %v593_v8 = vpop.trf.xlu0 }
 0x1a2   : > { %2711 = vmatmul.msk.f32.gmra.mxu1 %vm608_vm0, %v593_v8  ;;  %v824_v25 = vadd.f32 3.0, %v741_v15  ;;  %v951_v28 = vmul.f32 %v919_v23, %v738_v61  ;;  %v1046_v61 = vmul.f32 %v3464_v6, %v1013_v24  ;;  %v1239_v8 = vmul.f32 %v3474_v16, %v1206_v51 }
 0x1a3   : > { %v1724_v36 = vmul.f32 %v3520_v13, %v1112_v22  ;;  %v3537_v41 = vld [vmem:[#allocation2 + $0x48] sm:$0xff] }
 0x1a4   : > { %v856_v32 = vmax.f32 %v824_v25, 0.0  ;;  %983 = vst.msk [vmem:[#allocation2 + $0x51] sm:$0xff] %vm492_vm1, %v951_v28  ;;  %v1175_v19 = vadd.f32 %v1143_v0, %v1046_v61  ;;  %v1111_v28 = vld [vmem:[#allocation2 + $0x31] sm:$0xff]  ;;  %v1628_v53 = vmul.f32 %v3497_v56, %v3537_v41  ;;  %v1047_v61 = vmul.f32 %v3464_v6, %v1014_v63  ;;  %v1113_v11 = vld [vmem:[#allocation2 + $0x49] sm:$0xff] }
 0x1a6   : > { %v888_v38 = vmin.f32 %v856_v32, 6.0  ;;  %v1240_v32 = vmul.f32 %v3474_v16, %v1207_v55 }
 0x1a7   : > { %v743_v26 = vpop.f32.mrf.mxu0 }
 0x1a8   : > { %v744_v29 = vadd.f32 %v3436_v20, %v743_v26  ;;  %v920_v43 = vmul.f32 0.16666667, %v888_v38  ;;  %v1271_v26 = vadd.f32 %v1239_v8, %v1174_v14  ;;  %v1723_v38 = vmul.f32 %v3520_v13, %v1111_v28 }
 0x1a9   : > { %v594_v33 = vpop.trf.xlu0  ;;  %v1048_v8 = vmul.f32 %v3464_v6, %v3499_v57 }
 0x1aa   : > { %v825_v37 = vadd.f32 3.0, %v744_v29  ;;  %2712 = vmatmul.msk.f32.gmra.mxu1 %vm608_vm0, %v594_v33  ;;  %v952_v48 = vmul.f32 %v920_v43, %v741_v15  ;;  %v1561_v15 = vadd.f32 %v1529_v9, %v1464_v62  ;;  %v1658_v33 = vadd.f32 %v1626_v12, %v1560_v21 }
 0x1ab   : > { %v1433_v43 = vmul.f32 %v3489_v44, %v1111_v28  ;;  %v3549_v2 = vld [vmem:[#allocation2 + $0x50] sm:$0xff]  ;;  %v1145_v9 = vmul.f32 %v3467_v7, %v1112_v22 }
 0x1ac   : > { %v857_v39 = vmax.f32 %v825_v37, 0.0  ;;  %984 = vst.msk [vmem:[#allocation2 + $0x61] sm:$0xff] %vm492_vm1, %v952_v48  ;;  %v1659_v31 = vadd.f32 %v1627_v10, %v1561_v15  ;;  %v1272_v37 = vadd.f32 %v1240_v32, %v1175_v19  ;;  %v3555_v12 = vld [vmem:[#allocation2 + $0x4a] sm:$0xff]  ;;  %v1241_v15 = vmul.f32 %v3474_v16, %v1208_v30 }
 0x1ad   : > { %v1629_v57 = vmul.f32 %v3497_v56, %v3549_v2 }
 0x1ae   : > { %v889_v49 = vmin.f32 %v857_v39, 6.0  ;;  %v1209_v39 = vld [vmem:[#allocation2 + $0x3a] sm:$0xff]  ;;  %v1756_v46 = vadd.f32 %v1724_v36, %v1659_v31  ;;  %v1339_v36 = vmul.f32 %v3480_v27, %v3549_v2 }
 0x1af   : > { %v746_v50 = vpop.f32.mrf.mxu0  ;;  %v1821_v52 = vmul.f32 %v3523_v18, %v1209_v39  ;;  %v1242_v32 = vmul.f32 %v3474_v16, %v1209_v39 }
 0x1b0   : > { %v921_v4 = vmul.f32 0.16666667, %v889_v49  ;;  %v3512_v5 = vadd.f32 %v3436_v20, %v746_v50  ;;  %v1755_v49 = vadd.f32 %v1723_v38, %v1658_v33  ;;  %v1369_v50 = vadd.f32 %v1337_v34, %v1272_v37 }
 0x1b1   : > { %v595_v58 = vpop.trf.xlu0  ;;  %v1853_v0 = vadd.f32 %v1821_v52, %v1756_v46  ;;  %v1338_v33 = vmul.f32 %v3480_v27, %v3537_v41 }
 0x1b2   : > { %2713 = vmatmul.msk.f32.gmra.mxu1 %vm608_vm0, %v595_v58  ;;  %v953_v23 = vmul.f32 %v921_v4, %v744_v29  ;;  %v826_v24 = vadd.f32 3.0, %v3512_v5  ;;  %v1368_v29 = vadd.f32 %v1336_v17, %v1271_v26  ;;  %v1852_v55 = vadd.f32 %v1820_v40, %v1755_v49  ;;  %v3546_v58 = vld [vmem:[#allocation9] ss:$0 sm:$0xff] }
 0x1b3   : > { %v1144_v4 = vmul.f32 %v3467_v7, %v1111_v28  ;;  %v1466_v10 = vadd.f32 %v1434_v54, %v1369_v50  ;;  %v1531_v17 = vmul.f32 %v3492_v47, %v1209_v39  ;;  %v3566_v22 = vadd.f32 %v3546_v58, %v1853_v0 }
 0x1b4   : > { %985 = vst.msk [vmem:[#allocation2 + $0x69] sm:$0xff] %vm492_vm1, %v953_v23  ;;  %v858_v42 = vmax.f32 %v826_v24, 0.0  ;;  %v1465_v51 = vadd.f32 %v1433_v43, %v1368_v29  ;;  %v3561_v19 = vadd.f32 %v3546_v58, %v1852_v55  ;;  %v1725_v23 = vmul.f32 %v3520_v13, %v1113_v11 }
 0x1b5   : > { %v1822_v24 = vmul.f32 %v3523_v18, %v3555_v12  ;;  %v1176_v26 = vadd.f32 %v1144_v4, %v1047_v61  ;;  %v1177_v28 = vadd.f32 %v1145_v9, %v1048_v8  ;;  %v1563_v30 = vadd.f32 %v1531_v17, %v1466_v10  ;;  %v1018_v8 = vld [vmem:[#allocation2 + $0x60] sm:$0xff] }
 0x1b6   : > { %v890_v59 = vmin.f32 %v858_v42, 6.0  ;;  %v1562_v62 = vadd.f32 %v1530_v45, %v1465_v51  ;;  %v1920_v42 = vadd.f32 3.0, %v3561_v19  ;;  %v1921_v43 = vadd.f32 3.0, %v3566_v22 }
 0x1b7   : > { %v749_v25 = vpop.f32.mrf.mxu0  ;;  %v1273_v29 = vadd.f32 %v1241_v15, %v1176_v26  ;;  %v1661_v37 = vadd.f32 %v1629_v57, %v1563_v30  ;;  %v1274_v39 = vadd.f32 %v1242_v32, %v1177_v28  ;;  %v1435_v0 = vmul.f32 %v3489_v44, %v1113_v11 }
 0x1b8   : > { %v3527_v1 = vadd.f32 %v3436_v20, %v749_v25  ;;  %v1660_v63 = vadd.f32 %v1628_v53, %v1562_v62  ;;  %v922_v21 = vmul.f32 0.16666667, %v890_v59  ;;  %v1211_v53 = vld [vmem:[#allocation2 + $0x52] sm:$0xff]  ;;  %v1952_v61 = vmax.f32 %v1920_v42, 0.0 }
 0x1b9   : > { %v596_v35 = vpop.trf.xlu0  ;;  %v1370_v52 = vadd.f32 %v1338_v33, %v1273_v29  ;;  %v1371_v54 = vadd.f32 %v1339_v36, %v1274_v39  ;;  %v1953_v62 = vmax.f32 %v1921_v43, 0.0  ;;  %v1049_v10 = vmul.f32 %v3464_v6, %v3537_v41 }
 0x1ba   : > { %2714 = vmatmul.msk.f32.gmra.mxu1 %vm608_vm0, %v596_v35  ;;  %v827_v48 = vadd.f32 3.0, %v3527_v1  ;;  %v1757_v34 = vadd.f32 %v1725_v23, %v1660_v63  ;;  %v1114_v35 = vld [vmem:[#allocation2 + $0x51] sm:$0xff]  ;;  %v954_v38 = vmul.f32 %v922_v21, %v3512_v5  ;;  %v1532_v63 = vmul.f32 %v3492_v47, %v3555_v12 }
 0x1bb   : > { %v1436_v4 = vmul.f32 %v3489_v44, %v1114_v35  ;;  %v1467_v15 = vadd.f32 %v1435_v0, %v1370_v52  ;;  %v3600_v17 = vld [vmem:[#allocation2 + $0x68] sm:$0xff]  ;;  %v1984_v26 = vmin.f32 %v1952_v61, 6.0  ;;  %v1985_v28 = vmin.f32 %v1953_v62, 6.0 }
 0x1bc   : > { %v859_v3 = vmax.f32 %v827_v48, 0.0  ;;  %v1854_v45 = vadd.f32 %v1822_v24, %v1757_v34  ;;  %v1726_v48 = vmul.f32 %v3520_v13, %v1114_v35  ;;  %986 = vst.msk [vmem:[#allocation2 + $0x79] sm:$0xff] %vm492_vm1, %v954_v38  ;;  %v1630_v32 = vmul.f32 %v3497_v56, %v1018_v8  ;;  %v3614_v42 = vld [vmem:[#allocation2 + $0x62] sm:$0xff] }
 0x1bd   : > { %v1468_v57 = vadd.f32 %v1436_v4, %v1371_v54  ;;  %v1050_v41 = vmul.f32 %v3464_v6, %v3549_v2  ;;  %v1533_v33 = vmul.f32 %v3492_v47, %v1211_v53  ;;  %v1631_v34 = vmul.f32 %v3497_v56, %v3600_v17 }
 0x1be   : > { %v891_v25 = vmin.f32 %v859_v3, 6.0  ;;  %v1758_v55 = vadd.f32 %v1726_v48, %v1661_v37  ;;  %v3590_v3 = vadd.f32 %v3546_v58, %v1854_v45  ;;  %v1564_v36 = vadd.f32 %v1532_v63, %v1467_v15  ;;  %v1116_v48 = vld [vmem:[#allocation2 + $0x69] sm:$0xff] }
 0x1bf   : > { %v752_v60 = vpop.f32.mrf.mxu0  ;;  %v1565_v37 = vadd.f32 %v1533_v33, %v1468_v57  ;;  %v1244_v54 = vmul.f32 %v3474_v16, %v1211_v53 }
 0x1c0   : > { %v753_v31 = vadd.f32 %v3436_v20, %v752_v60  ;;  %v923_v46 = vmul.f32 0.16666667, %v891_v25  ;;  %v1922_v30 = vadd.f32 3.0, %v3590_v3  ;;  %v1662_v39 = vadd.f32 %v1630_v32, %v1564_v36 }
 0x1c1   : > { %v597_v14 = vpop.trf.xlu0 }
 0x1c2   : > { %2715 = vmatmul.msk.f32.gmra.mxu1 %vm608_vm0, %v597_v14  ;;  %v828_v49 = vadd.f32 3.0, %v753_v31  ;;  %v955_v5 = vmul.f32 %v923_v46, %v3527_v1  ;;  %v1823_v1 = vmul.f32 %v3523_v18, %v1211_v53  ;;  %v1146_v14 = vmul.f32 %v3467_v7, %v1113_v11  ;;  %v1213_v53 = vld [vmem:[#allocation2 + $0x6a] sm:$0xff] }
 0x1c3   : > { %v1147_v11 = vmul.f32 %v3467_v7, %v1114_v35  ;;  %v1243_v35 = vmul.f32 %v3474_v16, %v3555_v12  ;;  %v1954_v46 = vmax.f32 %v1922_v30, 0.0  ;;  %v1825_v30 = vmul.f32 %v3523_v18, %v1213_v53  ;;  %v3644_v33 = vld [vmem:[#allocation2 + $0x78] sm:$0xff] }
 0x1c4   : > { %v860_v59 = vmax.f32 %v828_v49, 0.0  ;;  %987 = vst.msk [vmem:[#allocation2 + $0x81] sm:$0xff] %vm492_vm1, %v955_v5  ;;  %v1855_v21 = vadd.f32 %v1823_v1, %v1758_v55  ;;  %v1178_v45 = vadd.f32 %v1146_v14, %v1049_v10  ;;  %v2016_v49 = vmul.f32 0.16666667, %v1984_v26 }
 0x1c5   : > { %v1179_v52 = vadd.f32 %v1147_v11, %v1050_v41  ;;  %v1663_v5 = vadd.f32 %v1631_v34, %v1565_v37  ;;  %v1340_v55 = vmul.f32 %v3480_v27, %v1018_v8  ;;  %v1986_v1 = vmin.f32 %v1954_v46, 6.0 }
 0x1c6   : > { %v892_v9 = vmin.f32 %v860_v59, 6.0  ;;  %v3612_v38 = vadd.f32 %v3546_v58, %v1855_v21  ;;  %v1824_v59 = vmul.f32 %v3523_v18, %v3614_v42  ;;  %v1275_v4 = vadd.f32 %v1243_v35, %v1178_v45 }
 0x1c7   : > { %v755_v40 = vpop.f32.mrf.mxu0  ;;  %v1341_v10 = vmul.f32 %v3480_v27, %v3600_v17  ;;  %v3632_v14 = vmul.f32 %v2016_v49, %v3561_v19  ;;  %v1276_v63 = vadd.f32 %v1244_v54, %v1179_v52  ;;  %v1149_v35 = vmul.f32 %v3467_v7, %v1116_v48 }
 0x1c8   : > { %v3583_v50 = vadd.f32 %v3436_v20, %v755_v40  ;;  %v924_v23 = vmul.f32 0.16666667, %v892_v9  ;;  %v1115_v40 = vld [vmem:[#allocation2 + $0x61] sm:$0xff]  ;;  %v1923_v12 = vadd.f32 3.0, %v3612_v38  ;;  %v1632_v46 = vmul.f32 %v3497_v56, %v3644_v33 }
 0x1c9   : > { %v598_v51 = vpop.trf.xlu0  ;;  %4689 = vst [vmem:[#allocation21_spill] sm:$0xff] %v3632_v14  ;;  %v1437_v41 = vmul.f32 %v3489_v44, %v1115_v40  ;;  %v1373_v11 = vadd.f32 %v1341_v10, %v1276_v63  ;;  %v2080_v34 = vsel %vm492_vm1, %v3632_v14, 0.0  ;;  %v1623_v14 = vld [vmem:[#allocation2 + $0x198] sm:$0xff] }
 0x1ca   : > { %2716 = vmatmul.msk.f32.gmra.mxu1 %vm608_vm0, %v598_v51  ;;  %v829_v60 = vadd.f32 3.0, %v3583_v50  ;;  %v956_v43 = vmul.f32 %v924_v23, %v753_v31  ;;  %v2017_v51 = vmul.f32 0.16666667, %v1985_v28  ;;  %v1727_v31 = vmul.f32 %v3520_v13, %v1115_v40 }
 0x1cb   : > { %v1051_v23 = vmul.f32 %v3464_v6, %v1018_v8  ;;  %v1955_v28 = vmax.f32 %v1923_v12, 0.0 }
 0x1cc   : > { %v861_v24 = vmax.f32 %v829_v60, 0.0  ;;  %988 = vst.msk [vmem:[#allocation2 + $0x91] sm:$0xff] %vm492_vm1, %v956_v43  ;;  %v1728_v60 = vmul.f32 %v3520_v13, %v1116_v48  ;;  %v1759_v9 = vadd.f32 %v1727_v31, %v1662_v39  ;;  %v3635_v15 = vmul.f32 %v2017_v51, %v3566_v22  ;;  %v1021_v39 = vld [vmem:[#allocation2 + $0x80] sm:$0xff] }
 0x1cd   : > { %v2018_v22 = vmul.f32 0.16666667, %v1986_v1  ;;  %v1438_v43 = vmul.f32 %v3489_v44, %v1116_v48  ;;  %v1987_v45 = vmin.f32 %v1955_v28, 6.0  ;;  %v1633_v1 = vmul.f32 %v3497_v56, %v1021_v39 }
 0x1ce   : > { %v893_v2 = vmin.f32 %v861_v24, 6.0  ;;  %4690 = vst [vmem:[#allocation22_spill] sm:$0xff] %v3635_v15  ;;  %v1760_v57 = vadd.f32 %v1728_v60, %v1663_v5  ;;  %v1148_v24 = vmul.f32 %v3467_v7, %v1115_v40  ;;  %v1856_v26 = vadd.f32 %v1824_v59, %v1759_v9 }
 0x1cf   : > { %v758_v25 = vpop.f32.mrf.mxu0  ;;  %v1052_v40 = vmul.f32 %v3464_v6, %v3600_v17  ;;  %v3666_v52 = vmul.f32 %v2018_v22, %v3590_v3  ;;  %v1470_v54 = vadd.f32 %v1438_v43, %v1373_v11  ;;  %v1246_v60 = vmul.f32 %v3474_v16, %v1213_v53 }
 0x1d0   : > { %v925_v61 = vmul.f32 0.16666667, %v893_v2  ;;  %v3627_v62 = vadd.f32 %v3436_v20, %v758_v25  ;;  %v1372_v25 = vadd.f32 %v1340_v55, %v1275_v4  ;;  %v1857_v36 = vadd.f32 %v1825_v30, %v1760_v57  ;;  %v3680_v4 = vld [vmem:[#allocation2 + $0x7a] sm:$0xff] }
 0x1d1   : > { %v599_v29 = vpop.trf.xlu0  ;;  %v3660_v2 = vadd.f32 %v3546_v58, %v1856_v26  ;;  %4691 = vst [vmem:[#allocation23_spill] sm:$0xff] %v3666_v52  ;;  %v1180_v5 = vadd.f32 %v1148_v24, %v1051_v23  ;;  %v1245_v55 = vmul.f32 %v3474_v16, %v3614_v42  ;;  %v1535_v3 = vmul.f32 %v3492_v47, %v1213_v53  ;;  %v1118_v26 = vld [vmem:[#allocation2 + $0x81] sm:$0xff] }
 0x1d2   : > { %2717 = vmatmul.msk.f32.gmra.mxu1 %vm608_vm0, %v599_v29  ;;  %v957_v19 = vmul.f32 %v925_v61, %v3583_v50  ;;  %v830_v32 = vadd.f32 3.0, %v3627_v62  ;;  %v2081_v29 = vsel %vm492_vm1, %v3635_v15, 0.0  ;;  %v1534_v50 = vmul.f32 %v3492_v47, %v3614_v42 }
 0x1d3   : > { %v1469_v37 = vadd.f32 %v1437_v41, %v1372_v25  ;;  %v3672_v59 = vadd.f32 %v3546_v58, %v1857_v36  ;;  %v1924_v61 = vadd.f32 3.0, %v3660_v2  ;;  %v2019_v42 = vmul.f32 0.16666667, %v1987_v45 }
 0x1d4   : > { %989 = vst.msk [vmem:[#allocation2 + $0x99] sm:$0xff] %vm492_vm1, %v957_v19  ;;  %v862_v49 = vmax.f32 %v830_v32, 0.0  ;;  %v1181_v9 = vadd.f32 %v1149_v35, %v1052_v40  ;;  %v2083_v57 = vsel %vm492_vm1, %v3666_v52, 0.0  ;;  %v1342_v53 = vmul.f32 %v3480_v27, %v3644_v33 }
 0x1d5   : > { %v1566_v31 = vadd.f32 %v1534_v50, %v1469_v37  ;;  %v1925_v24 = vadd.f32 3.0, %v3672_v59  ;;  %v1826_v28 = vmul.f32 %v3523_v18, %v3680_v4  ;;  %v2082_v19 = vadd.f32 %v2081_v29, %v2080_v34 }
 0x1d6   : > { %v894_v63 = vmin.f32 %v862_v49, 6.0  ;;  %v1277_v32 = vadd.f32 %v1245_v55, %v1180_v5  ;;  %v1956_v22 = vmax.f32 %v1924_v61, 0.0  ;;  %v3694_v11 = vmul.f32 %v2019_v42, %v3612_v38 }
 0x1d7   : > { %v761_v0 = vpop.f32.mrf.mxu0  ;;  %v1664_v10 = vadd.f32 %v1632_v46, %v1566_v31  ;;  %v1278_v50 = vadd.f32 %v1246_v60, %v1181_v9  ;;  %v3696_v43 = vadd.f32 %v2083_v57, %v2082_v19  ;;  %v1730_v35 = vmul.f32 %v3520_v13, %v1118_v26 }
 0x1d8   : > { %v3647_v8 = vadd.f32 %v3436_v20, %v761_v0  ;;  %v1117_v0 = vld [vmem:[#allocation2 + $0x79] sm:$0xff]  ;;  %4692 = vst [vmem:[#allocation24_spill] sm:$0xff] %v3694_v11  ;;  %v926_v37 = vmul.f32 0.16666667, %v894_v63  ;;  %v1374_v45 = vadd.f32 %v1342_v53, %v1277_v32  ;;  %v1957_v49 = vmax.f32 %v1925_v24, 0.0 }
 0x1d9   : > { %v600_v21 = vpop.trf.xlu0  ;;  %v1729_v25 = vmul.f32 %v3520_v13, %v1117_v0  ;;  %v1343_v34 = vmul.f32 %v3480_v27, %v1021_v39  ;;  %v1053_v38 = vmul.f32 %v3464_v6, %v3644_v33  ;;  %v1439_v55 = vmul.f32 %v3489_v44, %v1117_v0 }
 0x1da   : > { %2718 = vmatmul.msk.f32.gmra.mxu1 %vm608_vm0, %v600_v21  ;;  %v831_v17 = vadd.f32 3.0, %v3647_v8  ;;  %v1567_v21 = vadd.f32 %v1535_v3, %v1470_v54  ;;  %v1150_v60 = vmul.f32 %v3467_v7, %v1117_v0  ;;  %v1054_v3 = vmul.f32 %v3464_v6, %v1021_v39 }
 0x1db   : > { %v1761_v36 = vadd.f32 %v1729_v25, %v1664_v10  ;;  %v1536_v61 = vmul.f32 %v3492_v47, %v3680_v4  ;;  %v1471_v42 = vadd.f32 %v1439_v55, %v1374_v45  ;;  %v1151_v9 = vmul.f32 %v3467_v7, %v1118_v26 }
 0x1dc   : > { %v863_v23 = vmax.f32 %v831_v17, 0.0  ;;  %v1665_v41 = vadd.f32 %v1633_v1, %v1567_v21  ;;  %v1988_v17 = vmin.f32 %v1956_v22, 6.0  ;;  %v958_v1 = vmul.f32 %v926_v37, %v3627_v62  ;;  %v3730_v37 = vld [vmem:[#allocation2 + $0x92] sm:$0xff] }
 0x1dd   : > { %v1858_v29 = vadd.f32 %v1826_v28, %v1761_v36  ;;  %v1375_v63 = vadd.f32 %v1343_v34, %v1278_v50  ;;  %v1989_v21 = vmin.f32 %v1957_v49, 6.0  ;;  %v1182_v24 = vadd.f32 %v1150_v60, %v1053_v38 }
 0x1de   : > { %v895_v46 = vmin.f32 %v863_v23, 6.0  ;;  %v1762_v31 = vadd.f32 %v1730_v35, %v1665_v41  ;;  %990 = vst.msk [vmem:[#allocation2 + $0xa9] sm:$0xff] %vm492_vm1, %v958_v1  ;;  %v1440_v25 = vmul.f32 %v3489_v44, %v1118_v26  ;;  %v1568_v28 = vadd.f32 %v1536_v61, %v1471_v42  ;;  %v1120_v42 = vld [vmem:[#allocation2 + $0x99] sm:$0xff] }
 0x1df   : > { %v764_v51 = vpop.f32.mrf.mxu0  ;;  %v3714_v57 = vadd.f32 %v3546_v58, %v1858_v29  ;;  %v1183_v22 = vadd.f32 %v1151_v9, %v1054_v3  ;;  %v1247_v41 = vmul.f32 %v3474_v16, %v3680_v4  ;;  %v2020_v38 = vmul.f32 0.16666667, %v1988_v17 }
 0x1e0   : > { %v3675_v48 = vadd.f32 %v3436_v20, %v764_v51  ;;  %v1215_v51 = vld [vmem:[#allocation2 + $0x82] sm:$0xff]  ;;  %v927_v10 = vmul.f32 0.16666667, %v895_v46  ;;  %v2021_v55 = vmul.f32 0.16666667, %v1989_v21 }
 0x1e1   : > { %v601_v12 = vpop.trf.xlu0  ;;  %v1827_v33 = vmul.f32 %v3523_v18, %v1215_v51  ;;  %v1248_v50 = vmul.f32 %v3474_v16, %v1215_v51  ;;  %v1537_v36 = vmul.f32 %v3492_v47, %v1215_v51  ;;  %v1926_v26 = vadd.f32 3.0, %v3714_v57 }
 0x1e2   : > { %2719 = vmatmul.msk.f32.gmra.mxu1 %vm608_vm0, %v601_v12  ;;  %v832_v30 = vadd.f32 3.0, %v3675_v48  ;;  %v3703_v12 = vld [vmem:[#allocation2 + $0x90] sm:$0xff]  ;;  %v959_v62 = vmul.f32 %v927_v10, %v3647_v8  ;;  %v1279_v60 = vadd.f32 %v1247_v41, %v1182_v24  ;;  %v3758_v17 = vmul.f32 %v2020_v38, %v3660_v2 }
 0x1e3   : > { %v1634_v0 = vmul.f32 %v3497_v56, %v3703_v12  ;;  %v1859_v53 = vadd.f32 %v1827_v33, %v1762_v31  ;;  %v1119_v8 = vld [vmem:[#allocation2 + $0x91] sm:$0xff]  ;;  %v1344_v34 = vmul.f32 %v3480_v27, %v3703_v12  ;;  %v1280_v31 = vadd.f32 %v1248_v50, %v1183_v22  ;;  %v1217_v22 = vld [vmem:[#allocation2 + $0x9a] sm:$0xff] }
 0x1e4   : > { %v864_v5 = vmax.f32 %v832_v30, 0.0  ;;  %v3724_v30 = vld [vmem:[#allocation2 + $0x98] sm:$0xff]  ;;  %991 = vst.msk [vmem:[#allocation2 + $0xb1] sm:$0xff] %vm492_vm1, %v959_v62  ;;  %v1731_v29 = vmul.f32 %v3520_v13, %v1119_v8  ;;  %v1958_v61 = vmax.f32 %v1926_v26, 0.0  ;;  %v3761_v21 = vmul.f32 %v2021_v55, %v3672_v59 }
 0x1e5   : > { %v1666_v45 = vadd.f32 %v1634_v0, %v1568_v28  ;;  %v3736_v46 = vadd.f32 %v3546_v58, %v1859_v53  ;;  %v1345_v4 = vmul.f32 %v3480_v27, %v3724_v30  ;;  %v1376_v0 = vadd.f32 %v1344_v34, %v1279_v60  ;;  %4693 = vst [vmem:[#allocation25_spill] sm:$0xff] %v3758_v17  ;;  %v3764_v28 = vld [vmem:[#allocation2 + $0xa8] sm:$0xff] }
 0x1e6   : > { %v896_v39 = vmin.f32 %v864_v5, 6.0  ;;  %v1635_v5 = vmul.f32 %v3497_v56, %v3724_v30  ;;  %4694 = vst [vmem:[#allocation26_spill] sm:$0xff] %v3761_v21  ;;  %v1442_v24 = vmul.f32 %v3489_v44, %v1120_v42  ;;  %v1538_v41 = vmul.f32 %v3492_v47, %v3730_v37 }
 0x1e7   : > { %v767_v40 = vpop.f32.mrf.mxu0  ;;  %v1763_v1 = vadd.f32 %v1731_v29, %v1666_v45  ;;  %v1927_v9 = vadd.f32 3.0, %v3736_v46  ;;  %v1377_v33 = vadd.f32 %v1345_v4, %v1280_v31  ;;  %v1732_v50 = vmul.f32 %v3520_v13, %v1120_v42 }
 0x1e8   : > { %v3721_v23 = vadd.f32 %v3436_v20, %v767_v40  ;;  %v928_v19 = vmul.f32 0.16666667, %v896_v39  ;;  %v1472_v40 = vadd.f32 %v1440_v25, %v1375_v63  ;;  %v1636_v4 = vmul.f32 %v3497_v56, %v3764_v28 }
 0x1e9   : > { %v602_v54 = vpop.trf.xlu0  ;;  %v1055_v34 = vmul.f32 %v3464_v6, %v3703_v12  ;;  %v1152_v29 = vmul.f32 %v3467_v7, %v1119_v8  ;;  %v1829_v38 = vmul.f32 %v3523_v18, %v1217_v22 }
 0x1ea   : > { %2720 = vmatmul.msk.f32.gmra.mxu1 %vm608_vm0, %v602_v54  ;;  %v960_v35 = vmul.f32 %v928_v19, %v3675_v48  ;;  %v833_v49 = vadd.f32 3.0, %v3721_v23  ;;  %v1828_v48 = vmul.f32 %v3523_v18, %v3730_v37  ;;  %v2085_v54 = vsel %vm492_vm1, %v3694_v11, 0.0 }
 0x1eb   : > { %v1569_v3 = vadd.f32 %v1537_v36, %v1472_v40  ;;  %v2086_v25 = vadd.f32 %v2085_v54, %v3696_v43  ;;  %v1990_v19 = vmin.f32 %v1958_v61, 6.0  ;;  %v1959_v43 = vmax.f32 %v1927_v9, 0.0  ;;  %v3770_v2 = vld [vmem:[#allocation2 + $0xb0] sm:$0xff] }
 0x1ec   : > { %992 = vst.msk [vmem:[#allocation2 + $0xc1] sm:$0xff] %vm492_vm1, %v960_v35  ;;  %v865_v10 = vmax.f32 %v833_v49, 0.0  ;;  %v1860_v53 = vadd.f32 %v1828_v48, %v1763_v1  ;;  %v1474_v36 = vadd.f32 %v1442_v24, %v1377_v33  ;;  %v2087_v49 = vsel %vm492_vm1, %v3758_v17, 0.0  ;;  %v3788_v61 = vld [vmem:[#allocation2 + $0xaa] sm:$0xff] }
 0x1ed   : > { %v1667_v39 = vadd.f32 %v1635_v5, %v1569_v3  ;;  %v1539_v5 = vmul.f32 %v3492_v47, %v1217_v22  ;;  %v2022_v48 = vmul.f32 0.16666667, %v1990_v19  ;;  %v1637_v55 = vmul.f32 %v3497_v56, %v3770_v2  ;;  %v3786_v3 = vld [vmem:[#allocation2 + $0xa9] sm:$0xff] }
 0x1ee   : > { %v897_v40 = vmin.f32 %v865_v10, 6.0  ;;  %v3773_v35 = vadd.f32 %v3546_v58, %v1860_v53  ;;  %v1991_v31 = vmin.f32 %v1959_v43, 6.0  ;;  %v2088_v12 = vadd.f32 %v2087_v49, %v2086_v25 }
 0x1ef   : > { %v770_v32 = vpop.f32.mrf.mxu0  ;;  %v1764_v45 = vadd.f32 %v1732_v50, %v1667_v39  ;;  %v1571_v60 = vadd.f32 %v1539_v5, %v1474_v36  ;;  %v1184_v39 = vadd.f32 %v1152_v29, %v1055_v34  ;;  %v1056_v53 = vmul.f32 %v3464_v6, %v3724_v30 }
 0x1f0   : > { %v3742_v51 = vadd.f32 %v3436_v20, %v770_v32  ;;  %v1441_v32 = vmul.f32 %v3489_v44, %v1119_v8  ;;  %v929_v1 = vmul.f32 0.16666667, %v897_v40  ;;  %v1928_v8 = vadd.f32 3.0, %v3773_v35 }
 0x1f1   : > { %v1861_v33 = vadd.f32 %v1829_v38, %v1764_v45  ;;  %v1153_v24 = vmul.f32 %v3467_v7, %v1120_v42  ;;  %v1669_v19 = vadd.f32 %v1637_v55, %v1571_v60  ;;  %v1249_v25 = vmul.f32 %v3474_v16, %v3730_v37 }
 0x1f2   : > { %v834_v63 = vadd.f32 3.0, %v3742_v51  ;;  %v1473_v26 = vadd.f32 %v1441_v32, %v1376_v0  ;;  %v3797_v32 = vmul.f32 %v2022_v48, %v3714_v57  ;;  %v1830_v50 = vmul.f32 %v3523_v18, %v3788_v61 }
 0x1f3   : > { %v2023_v43 = vmul.f32 0.16666667, %v1991_v31  ;;  %v961_v30 = vmul.f32 %v929_v1, %v3721_v23  ;;  %v3809_v40 = vadd.f32 %v3546_v58, %v1861_v33  ;;  %v1960_v57 = vmax.f32 %v1928_v8, 0.0 }
 0x1f4   : > { %v866_v59 = vmax.f32 %v834_v63, 0.0  ;;  %v1570_v54 = vadd.f32 %v1538_v41, %v1473_v26  ;;  %v3791_v63 = vld [vmem:[#allocation2 + $0xb1] sm:$0xff]  ;;  %4695 = vst [vmem:[#allocation27_spill] sm:$0xff] %v3797_v32  ;;  %v1733_v41 = vmul.f32 %v3520_v13, %v3786_v3  ;;  %v1185_v45 = vadd.f32 %v1153_v24, %v1056_v53 }
 0x1f5   : > { %v1734_v36 = vmul.f32 %v3520_v13, %v3791_v63  ;;  %v3811_v26 = vld [vmem:[#allocation2 + $0xb2] sm:$0xff]  ;;  %993 = vst.msk [vmem:[#allocation2 + $0xc9] sm:$0xff] %vm492_vm1, %v961_v30  ;;  %v2089_v34 = vsel %vm492_vm1, %v3761_v21, 0.0  ;;  %v1347_v38 = vmul.f32 %v3480_v27, %v3770_v2  ;;  %v2091_v31 = vsel %vm492_vm1, %v3797_v32, 0.0 }
 0x1f6   : > { %v898_v9 = vmin.f32 %v866_v59, 6.0  ;;  %v1668_v10 = vadd.f32 %v1636_v4, %v1570_v54  ;;  %v1346_v4 = vmul.f32 %v3480_v27, %v3764_v28  ;;  %v1281_v54 = vadd.f32 %v1249_v25, %v1184_v39 }
 0x1f7   : > { %v773_v62 = vpop.f32.mrf.mxu1  ;;  %v1766_v49 = vadd.f32 %v1734_v36, %v1669_v19  ;;  %v1831_v55 = vmul.f32 %v3523_v18, %v3811_v26  ;;  %v1992_v60 = vmin.f32 %v1960_v57, 6.0  ;;  %v1443_v24 = vmul.f32 %v3489_v44, %v3786_v3 }
 0x1f8   : > { %v930_v42 = vmul.f32 0.16666667, %v898_v9  ;;  %v1765_v59 = vadd.f32 %v1733_v41, %v1668_v10  ;;  %v3814_v37 = vadd.f32 %v3436_v20, %v773_v62  ;;  %v1250_v62 = vmul.f32 %v3474_v16, %v1217_v22 }
 0x1f9   : > { %v2090_v22 = vadd.f32 %v2089_v34, %v2088_v12  ;;  %v1378_v33 = vadd.f32 %v1346_v4, %v1281_v54  ;;  %v1863_v8 = vadd.f32 %v1831_v55, %v1766_v49  ;;  %v1540_v25 = vmul.f32 %v3492_v47, %v3788_v61  ;;  %v1123_v55 = vld [vmem:[#allocation2 + $0xc1] sm:$0xff] }
 0x1fa   : > { %v962_v23 = vmul.f32 %v930_v42, %v3742_v51  ;;  %v1862_v29 = vadd.f32 %v1830_v50, %v1765_v59  ;;  %v835_v5 = vadd.f32 3.0, %v3814_v37  ;;  %v3833_v51 = vmul.f32 %v2023_v43, %v3736_v46 }
 0x1fb   : > { %v1282_v9 = vadd.f32 %v1250_v62, %v1185_v45  ;;  %v2092_v53 = vadd.f32 %v2091_v31, %v2090_v22  ;;  %v2024_v50 = vmul.f32 0.16666667, %v1992_v60  ;;  %v1057_v43 = vmul.f32 %v3464_v6, %v3764_v28 }
 0x1fc   : > { %994 = vst.msk [vmem:[#allocation2 + $0xd9] sm:$0xff] %vm492_vm1, %v962_v23  ;;  %v3839_v10 = vadd.f32 %v3546_v58, %v1862_v29  ;;  %v867_v39 = vmax.f32 %v835_v5, 0.0  ;;  %v2093_v12 = vsel %vm492_vm1, %v3833_v51, 0.0  ;;  %v1475_v36 = vadd.f32 %v1443_v24, %v1378_v33  ;;  %v3862_v4 = vld [vmem:[#allocation2 + $0xc8] sm:$0xff]  ;;  %v3864_v29 = vld [vmem:[#allocation8] ss:$0 sm:$0xff] }
 0x1fd   : > { %4696 = vst [vmem:[#allocation28_spill] sm:$0xff] %v3833_v51  ;;  %v1379_v19 = vadd.f32 %v1347_v38, %v1282_v9  ;;  %v1444_v30 = vmul.f32 %v3489_v44, %v3791_v63  ;;  %v3855_v42 = vadd.f32 %v3546_v58, %v1863_v8  ;;  %v1154_v59 = vmul.f32 %v3467_v7, %v3786_v3  ;;  %v3872_v3 = vld [vmem:[#allocation2 + $0xc2] sm:$0xff] }
 0x1fe   : > { %v1930_v45 = vadd.f32 3.0, %v3839_v10  ;;  %v899_v49 = vmin.f32 %v867_v39, 6.0  ;;  %v1572_v34 = vadd.f32 %v1540_v25, %v1475_v36  ;;  %v2094_v62 = vadd.f32 %v2093_v12, %v2092_v53 }
 0x1ff   : > { %v776_v0 = vpop.f32.mrf.mxu1  ;;  %v1476_v28 = vadd.f32 %v1444_v30, %v1379_v19  ;;  %v3870_v38 = vmul.f32 %v2024_v50, %v3773_v35  ;;  %v1931_v60 = vadd.f32 3.0, %v3855_v42  ;;  %v1186_v9 = vadd.f32 %v1154_v59, %v1057_v43  ;;  %v1124_v50 = vld [vmem:[#allocation2 + $0xc9] sm:$0xff] }
 0x200   : > { %v3824_v48 = vadd.f32 %v3436_v20, %v776_v0  ;;  %v1929_v20 = vadd.f32 3.0, %v3809_v40  ;;  %v3841_v0 = vld [vmem:[#allocation2 + $0xc0] sm:$0xff]  ;;  %v1962_v33 = vmax.f32 %v1930_v45, 0.0  ;;  %v931_v8 = vmul.f32 0.16666667, %v899_v49 }
 0x201   : > { %v1638_v57 = vmul.f32 %v3497_v56, %v3841_v0  ;;  %4697 = vst [vmem:[#allocation29_spill] sm:$0xff] %v3870_v38  ;;  %v1832_v53 = vmul.f32 %v3523_v18, %v3872_v3  ;;  %v1058_v25 = vmul.f32 %v3464_v6, %v3770_v2  ;;  %v1155_v12 = vmul.f32 %v3467_v7, %v3791_v63 }
 0x202   : > { %v836_v46 = vadd.f32 3.0, %v3824_v48  ;;  %v1961_v41 = vmax.f32 %v1929_v20, 0.0  ;;  %v1541_v20 = vmul.f32 %v3492_v47, %v3811_v26  ;;  %v2095_v43 = vsel %vm492_vm1, %v3870_v38, 0.0 }
 0x203   : > { %v1670_v22 = vadd.f32 %v1638_v57, %v1572_v34  ;;  %v1963_v36 = vmax.f32 %v1931_v60, 0.0  ;;  %v1252_v59 = vmul.f32 %v3474_v16, %v3811_v26  ;;  %v1994_v45 = vmin.f32 %v1962_v33, 6.0  ;;  %v1221_v60 = vld [vmem:[#allocation2 + $0xca] sm:$0xff] }
 0x204   : > { %v868_v23 = vmax.f32 %v836_v46, 0.0  ;;  %v1993_v54 = vmin.f32 %v1961_v41, 6.0  ;;  %v1573_v35 = vadd.f32 %v1541_v20, %v1476_v28  ;;  %v1735_v46 = vmul.f32 %v3520_v13, %v1123_v55 }
 0x205   : > { %v1251_v41 = vmul.f32 %v3474_v16, %v3788_v61  ;;  %v963_v49 = vmul.f32 %v931_v8, %v3814_v37  ;;  %v1348_v63 = vmul.f32 %v3480_v27, %v3841_v0  ;;  %v1187_v20 = vadd.f32 %v1155_v12, %v1058_v25  ;;  %v1028_v12 = vld [vmem:[#allocation2 + $0xd8] sm:$0xff] }
 0x206   : > { %v900_v39 = vmin.f32 %v868_v23, 6.0  ;;  %v2025_v19 = vmul.f32 0.16666667, %v1993_v54  ;;  %v1767_v30 = vadd.f32 %v1735_v46, %v1670_v22  ;;  %v1736_v23 = vmul.f32 %v3520_v13, %v1124_v50 }
 0x207   : > { %v779_v1 = vpop.f32.mrf.mxu1  ;;  %v2096_v54 = vadd.f32 %v2095_v43, %v2094_v62  ;;  %995 = vst.msk [vmem:[#allocation2 + $0xe1] sm:$0xff] %vm492_vm1, %v963_v49  ;;  %v1283_v37 = vadd.f32 %v1251_v41, %v1186_v9  ;;  %v1156_v46 = vmul.f32 %v3467_v7, %v1123_v55  ;;  %v1157_v25 = vmul.f32 %v3467_v7, %v1124_v50 }
 0x208   : > { %v3867_v5 = vadd.f32 %v3864_v29, %v779_v1  ;;  %v1639_v1 = vmul.f32 %v3497_v56, %v3862_v4  ;;  %v932_v2 = vmul.f32 0.16666667, %v900_v39  ;;  %v1864_v61 = vadd.f32 %v1832_v53, %v1767_v30 }
 0x209   : > { %v3900_v34 = vmul.f32 %v2025_v19, %v3809_v40  ;;  %v2026_v39 = vmul.f32 0.16666667, %v1994_v45  ;;  %v1349_v40 = vmul.f32 %v3480_v27, %v3862_v4  ;;  %v1380_v62 = vadd.f32 %v1348_v63, %v1283_v37 }
 0x20a   : > { %v837_v24 = vadd.f32 3.0, %v3867_v5  ;;  %v1671_v57 = vadd.f32 %v1639_v1, %v1573_v35  ;;  %v964_v26 = vmul.f32 %v932_v2, %v3824_v48  ;;  %v1995_v1 = vmin.f32 %v1963_v36, 6.0 }
 0x20b   : > { %4698 = vst [vmem:[#allocation30_spill] sm:$0xff] %v3900_v34  ;;  %v1059_v35 = vmul.f32 %v3464_v6, %v3841_v0  ;;  %v1833_v53 = vmul.f32 %v3523_v18, %v1221_v60  ;;  %v3912_v48 = vadd.f32 %v3546_v58, %v1864_v61  ;;  %v1445_v19 = vmul.f32 %v3489_v44, %v1123_v55 }
 0x20c   : > { %v869_v28 = vmax.f32 %v837_v24, 0.0  ;;  %v1768_v33 = vadd.f32 %v1736_v23, %v1671_v57  ;;  %996 = vst.msk [vmem:[#allocation2 + $0xf1] sm:$0xff] %vm492_vm1, %v964_v26  ;;  %v1284_v24 = vadd.f32 %v1252_v59, %v1187_v20  ;;  %v1060_v0 = vmul.f32 %v3464_v6, %v3862_v4 }
 0x20d   : > { %v2027_v41 = vmul.f32 0.16666667, %v1995_v1  ;;  %v1253_v43 = vmul.f32 %v3474_v16, %v3872_v3  ;;  %v2097_v57 = vsel %vm492_vm1, %v3900_v34, 0.0  ;;  %v3924_v59 = vmul.f32 %v2026_v39, %v3839_v10 }
 0x20e   : > { %v901_v8 = vmin.f32 %v869_v28, 6.0  ;;  %v1865_v36 = vadd.f32 %v1833_v53, %v1768_v33  ;;  %v1381_v55 = vadd.f32 %v1349_v40, %v1284_v24  ;;  %v1542_v4 = vmul.f32 %v3492_v47, %v3872_v3  ;;  %v3933_v28 = vld [vmem:[#allocation2 + $0xe0] sm:$0xff] }
 0x20f   : > { %v3874_v31 = vpop.f32.mrf.mxu1  ;;  %4699 = vst [vmem:[#allocation31_spill] sm:$0xff] %v3924_v59  ;;  %v1188_v45 = vadd.f32 %v1156_v46, %v1059_v35  ;;  %v1477_v49 = vadd.f32 %v1445_v19, %v1380_v62  ;;  %v1932_v2 = vadd.f32 3.0, %v3912_v48  ;;  %v1350_v63 = vmul.f32 %v3480_v27, %v1028_v12  ;;  %v1125_v35 = vld [vmem:[#allocation2 + $0xd9] sm:$0xff] }
 0x210   : > { %v933_v9 = vmul.f32 0.16666667, %v901_v8  ;;  %v1189_v23 = vadd.f32 %v1157_v25, %v1060_v0  ;;  %v1640_v61 = vmul.f32 %v3497_v56, %v1028_v12  ;;  %v3937_v10 = vadd.f32 %v3864_v29, %v3874_v31 }
 0x211   : > { %v2098_v20 = vadd.f32 %v2097_v57, %v2096_v54  ;;  %v3942_v26 = vmul.f32 %v2027_v41, %v3855_v42  ;;  %v1285_v37 = vadd.f32 %v1253_v43, %v1188_v45  ;;  %v3945_v1 = vadd.f32 %v3546_v58, %v1865_v36  ;;  %v1222_v54 = vld [vmem:[#allocation2 + $0xda] sm:$0xff] }
 0x212   : > { %v965_v30 = vmul.f32 %v933_v9, %v3867_v5  ;;  %v1446_v5 = vmul.f32 %v3489_v44, %v1124_v50  ;;  %v2099_v50 = vsel %vm492_vm1, %v3924_v59, 0.0  ;;  %v1254_v33 = vmul.f32 %v3474_v16, %v1221_v60 }
 0x213   : > { %4700 = vst [vmem:[#allocation32_spill] sm:$0xff] %v3942_v26  ;;  %v1574_v39 = vadd.f32 %v1542_v4, %v1477_v49  ;;  %v1543_v31 = vmul.f32 %v3492_v47, %v1221_v60  ;;  %v1964_v46 = vmax.f32 %v1932_v2, 0.0  ;;  %v1382_v40 = vadd.f32 %v1350_v63, %v1285_v37  ;;  %v3960_v25 = vld [vmem:[#allocation2 + $0xf0] sm:$0xff] }
 0x214   : > { %997 = vst.msk [vmem:[#allocation2 + $0xf9] sm:$0xff] %vm492_vm1, %v965_v30  ;;  %v1478_v8 = vadd.f32 %v1446_v5, %v1381_v55  ;;  %v1351_v42 = vmul.f32 %v3480_v27, %v3933_v28  ;;  %v1286_v62 = vadd.f32 %v1254_v33, %v1189_v23  ;;  %v1641_v9 = vmul.f32 %v3497_v56, %v3933_v28  ;;  %v1126_v30 = vld [vmem:[#allocation2 + $0xe1] sm:$0xff] }
 0x215   : > { %v1672_v53 = vadd.f32 %v1640_v61, %v1574_v39  ;;  %v838_v24 = vadd.f32 3.0, %v3937_v10  ;;  %v2101_v19 = vsel %vm492_vm1, %v3942_v26, 0.0  ;;  %v1933_v0 = vadd.f32 3.0, %v3945_v1 }
 0x216   : > { %v1447_v60 = vmul.f32 %v3489_v44, %v1125_v35  ;;  %v1575_v43 = vadd.f32 %v1543_v31, %v1478_v8  ;;  %v1737_v36 = vmul.f32 %v3520_v13, %v1125_v35  ;;  %v1544_v57 = vmul.f32 %v3492_v47, %v1222_v54 }
 0x217   : > { %v785_v22 = vpop.f32.mrf.mxu1  ;;  %v1834_v55 = vmul.f32 %v3523_v18, %v1222_v54  ;;  %v1996_v4 = vmin.f32 %v1964_v46, 6.0  ;;  %v1061_v45 = vmul.f32 %v3464_v6, %v1028_v12  ;;  %v1383_v2 = vadd.f32 %v1351_v42, %v1286_v62  ;;  %v1223_v46 = vld [vmem:[#allocation2 + $0xe2] sm:$0xff] }
 0x218   : > { %v3963_v41 = vadd.f32 %v3864_v29, %v785_v22  ;;  %v1479_v49 = vadd.f32 %v1447_v60, %v1382_v40  ;;  %v1769_v63 = vadd.f32 %v1737_v36, %v1672_v53  ;;  %v1673_v23 = vadd.f32 %v1641_v9, %v1575_v43  ;;  %v3975_v53 = vld [vmem:[#allocation2 + $0xf1] sm:$0xff] }
 0x219   : > { %v1642_v5 = vmul.f32 %v3497_v56, %v3960_v25  ;;  %v870_v22 = vmax.f32 %v838_v24, 0.0  ;;  %v1965_v37 = vmax.f32 %v1933_v0, 0.0  ;;  %v1158_v33 = vmul.f32 %v3467_v7, %v1125_v35 }
 0x21a   : > { %v1448_v8 = vmul.f32 %v3489_v44, %v1126_v30  ;;  %v839_v39 = vadd.f32 3.0, %v3963_v41  ;;  %v2100_v31 = vadd.f32 %v2099_v50, %v2098_v20  ;;  %v1576_v26 = vadd.f32 %v1544_v57, %v1479_v49 }
 0x21b   : > { %v1738_v12 = vmul.f32 %v3520_v13, %v1126_v30  ;;  %v1866_v40 = vadd.f32 %v1834_v55, %v1769_v63  ;;  %v2028_v42 = vmul.f32 0.16666667, %v1996_v4  ;;  %v3977_v9 = vld [vmem:[#allocation2 + $0xf8] sm:$0xff]  ;;  %v902_v43 = vmin.f32 %v870_v22, 6.0 }
 0x21c   : > { %v1480_v62 = vadd.f32 %v1448_v8, %v1383_v2  ;;  %v3979_v24 = vadd.f32 %v2101_v19, %v2100_v31  ;;  %v1674_v35 = vadd.f32 %v1642_v5, %v1576_v26  ;;  %v3981_v60 = vld [vmem:[#allocation2 + $0xf2] sm:$0xff]  ;;  %v1997_v36 = vmin.f32 %v1965_v37, 6.0 }
 0x21d   : > { %v1770_v0 = vadd.f32 %v1738_v12, %v1673_v23  ;;  %v1190_v20 = vadd.f32 %v1158_v33, %v1061_v45  ;;  %v1545_v50 = vmul.f32 %v3492_v47, %v1223_v46  ;;  %v871_v57 = vmax.f32 %v839_v39, 0.0  ;;  %v4000_v22 = vld [vmem:[#allocation2 + $0xf9] sm:$0xff] }
 0x21e   : > { %v1835_v55 = vmul.f32 %v3523_v18, %v1223_v46  ;;  %v3986_v4 = vadd.f32 %v3546_v58, %v1866_v40  ;;  %v1739_v49 = vmul.f32 %v3520_v13, %v3975_v53  ;;  %v1643_v19 = vmul.f32 %v3497_v56, %v3977_v9 }
 0x21f   : > { %v3939_v3 = vpop.f32.mrf.mxu1  ;;  %v3993_v26 = vmul.f32 %v2028_v42, %v3912_v48  ;;  %v1062_v45 = vmul.f32 %v3464_v6, %v3933_v28  ;;  %v1577_v2 = vadd.f32 %v1545_v50, %v1480_v62  ;;  %v1836_v63 = vmul.f32 %v3523_v18, %v3981_v60  ;;  %v4016_v50 = vld [vmem:[#allocation2 + $0xfa] sm:$0xff] }
 0x220   : > { %v1159_v23 = vmul.f32 %v3467_v7, %v1126_v30  ;;  %v1867_v58 = vadd.f32 %v1835_v55, %v1770_v0  ;;  %v1771_v5 = vadd.f32 %v1739_v49, %v1674_v35  ;;  %v934_v37 = vmul.f32 0.16666667, %v902_v43 }
 0x221   : > { %4701 = vst [vmem:[#allocation33_spill] sm:$0xff] %v3993_v26  ;;  %v2029_v8 = vmul.f32 0.16666667, %v1997_v36  ;;  %v1255_v39 = vmul.f32 %v3474_v16, %v1222_v54  ;;  %v1675_v48 = vadd.f32 %v1643_v19, %v1577_v2  ;;  %v903_v31 = vmin.f32 %v871_v57, 6.0  ;;  %v4011_v54 = vld [vmem:[#allocation9] ss:$0 sm:$0xff] }
 0x222   : > { %v1934_v12 = vadd.f32 3.0, %v3986_v4  ;;  %v1868_v28 = vadd.f32 %v1836_v63, %v1771_v5  ;;  %v966_v40 = vmul.f32 %v934_v37, %v3937_v10  ;;  %v789_v42 = vadd.f32 %v3864_v29, %v3939_v3 }
 0x223   : > { %v1256_v30 = vmul.f32 %v3474_v16, %v1223_v46  ;;  %v1740_v62 = vmul.f32 %v3520_v13, %v4000_v22  ;;  %v935_v0 = vmul.f32 0.16666667, %v903_v31  ;;  %v1191_v43 = vadd.f32 %v1159_v23, %v1062_v45  ;;  %v2151_v46 = vld [vmem:[%s4642_s5 + $0x8] sm:$0xff] }
 0x224   : > { %v4014_v36 = vadd.f32 %v4011_v54, %v1867_v58  ;;  %998 = vst.msk [vmem:[#allocation2 + $0x109] sm:$0xff] %vm492_vm1, %v966_v40  ;;  %v840_v10 = vadd.f32 3.0, %v789_v42  ;;  %2170 = vmatpush.msrb.mxu1 %v2151_v46  ;;  %v2103_v19 = vsel %vm492_vm1, %v3993_v26, 0.0  ;;  %v1966_v45 = vmax.f32 %v1934_v12, 0.0 }
 0x225   : > { %v1772_v57 = vadd.f32 %v1740_v62, %v1675_v48  ;;  %v967_v55 = vmul.f32 %v935_v0, %v3963_v41  ;;  %v4032_v2 = vadd.f32 %v4011_v54, %v1868_v28  ;;  %v1287_v23 = vadd.f32 %v1255_v39, %v1190_v20 }
 0x226   : > { %v872_v63 = vmax.f32 %v840_v10, 0.0  ;;  %v1352_v58 = vmul.f32 %v3480_v27, %v3960_v25  ;;  %v1288_v5 = vadd.f32 %v1256_v30, %v1191_v43  ;;  %v1935_v37 = vadd.f32 3.0, %v4014_v36 }
 0x227   : > { %v791_v61 = vpop.f32.mrf.mxu1  ;;  %999 = vst.msk [vmem:[#allocation2 + $0x111] sm:$0xff] %vm492_vm1, %v967_v55  ;;  %v1353_v20 = vmul.f32 %v3480_v27, %v3977_v9  ;;  %v1998_v28 = vmin.f32 %v1966_v45, 6.0  ;;  %v1063_v40 = vmul.f32 %v3464_v6, %v3960_v25  ;;  %v1936_v30 = vadd.f32 3.0, %v4032_v2 }
 0x228   : > { %v792_v35 = vadd.f32 %v3864_v29, %v791_v61  ;;  %v4026_v61 = vmul.f32 %v2029_v8, %v3945_v1  ;;  %v1837_v1 = vmul.f32 %v3523_v18, %v4016_v50  ;;  %v1384_v0 = vadd.f32 %v1352_v58, %v1287_v23 }
 0x229   : > { %v1064_v43 = vmul.f32 %v3464_v6, %v3977_v9  ;;  %v1161_v10 = vmul.f32 %v3467_v7, %v4000_v22  ;;  %v1967_v55 = vmax.f32 %v1935_v37, 0.0  ;;  %v1385_v23 = vadd.f32 %v1353_v20, %v1288_v5 }
 0x22a   : > { %4702 = vst [vmem:[#allocation34_spill] sm:$0xff] %v4026_v61  ;;  %v841_v49 = vadd.f32 3.0, %v792_v35  ;;  %v2105_v31 = vsel %vm492_vm1, %v4026_v61, 0.0  ;;  %v1869_v39 = vadd.f32 %v1837_v1, %v1772_v57  ;;  %v1160_v57 = vmul.f32 %v3467_v7, %v3975_v53 }
 0x22b   : > { %v1032_v45 = vld [vmem:[#allocation2 + $0x108] sm:$0xff]  ;;  %v1546_v9 = vmul.f32 %v3492_v47, %v3981_v60  ;;  %v2030_v1 = vmul.f32 0.16666667, %v1998_v28  ;;  %v1999_v26 = vmin.f32 %v1967_v55, 6.0  ;;  %v1450_v5 = vmul.f32 %v3489_v44, %v4000_v22 }
 0x22c   : > { %v873_v41 = vmax.f32 %v841_v49, 0.0  ;;  %v1449_v49 = vmul.f32 %v3489_v44, %v3975_v53  ;;  %v4061_v58 = vadd.f32 %v4011_v54, %v1869_v39  ;;  %v1193_v53 = vadd.f32 %v1161_v10, %v1064_v43 }
 0x22d   : > { %v1192_v59 = vadd.f32 %v1160_v57, %v1063_v40  ;;  %v4075_v28 = vmul.f32 %v2030_v1, %v3986_v4  ;;  %v1482_v22 = vadd.f32 %v1450_v5, %v1385_v23  ;;  %v1065_v1 = vmul.f32 %v3464_v6, %v1032_v45 }
 0x22e   : > { %v905_v12 = vmin.f32 %v873_v41, 6.0  ;;  %v1968_v41 = vmax.f32 %v1936_v30, 0.0  ;;  %v1481_v61 = vadd.f32 %v1449_v49, %v1384_v0  ;;  %v1226_v0 = vld [vmem:[#allocation2 + $0x10a] sm:$0xff] }
 0x22f   : > { %v794_v33 = vpop.f32.mrf.mxu1  ;;  %4703 = vst [vmem:[#allocation35_spill] sm:$0xff] %v4075_v28  ;;  %v1838_v23 = vmul.f32 %v3523_v18, %v1226_v0 }
 0x230   : > { %v4020_v3 = vadd.f32 %v3864_v29, %v794_v33  ;;  %v904_v33 = vmin.f32 %v872_v63, 6.0  ;;  %v937_v46 = vmul.f32 0.16666667, %v905_v12  ;;  %v1257_v63 = vmul.f32 %v3474_v16, %v3981_v60 }
 0x231   : > { %v2104_v12 = vadd.f32 %v2103_v19, %v3979_v24  ;;  %v1937_v24 = vadd.f32 3.0, %v4061_v58  ;;  %v1033_v19 = vld [vmem:[#allocation2 + $0x110] sm:$0xff]  ;;  %v2000_v30 = vmin.f32 %v1968_v41, 6.0 }
 0x232   : > { %v842_v8 = vadd.f32 3.0, %v4020_v3  ;;  %v936_v62 = vmul.f32 0.16666667, %v904_v33  ;;  %v969_v33 = vmul.f32 %v937_v46, %v792_v35  ;;  %v1578_v35 = vadd.f32 %v1546_v9, %v1481_v61 }
 0x233   : > { %v4068_v39 = vadd.f32 %v2105_v31, %v2104_v12  ;;  %v1289_v40 = vadd.f32 %v1257_v63, %v1192_v59  ;;  %v1547_v31 = vmul.f32 %v3492_v47, %v4016_v50  ;;  %v2031_v46 = vmul.f32 0.16666667, %v1999_v26  ;;  %v1130_v63 = vld [vmem:[#allocation2 + $0x111] sm:$0xff] }
 0x234   : > { %v874_v25 = vmax.f32 %v842_v8, 0.0  ;;  %v968_v37 = vmul.f32 %v936_v62, %v789_v42  ;;  %v1644_v8 = vmul.f32 %v3497_v56, %v1032_v45  ;;  %v1258_v42 = vmul.f32 %v3474_v16, %v4016_v50  ;;  %1001 = vst.msk [vmem:[#allocation2 + $0x129] sm:$0xff] %vm492_vm1, %v969_v33  ;;  %v1129_v62 = vld [vmem:[#allocation2 + $0x109] sm:$0xff] }
 0x235   : > { %v1355_v55 = vmul.f32 %v3480_v27, %v1033_v19  ;;  %v1645_v57 = vmul.f32 %v3497_v56, %v1033_v19  ;;  %v1969_v49 = vmax.f32 %v1937_v24, 0.0  ;;  %v1354_v59 = vmul.f32 %v3480_v27, %v1032_v45 }
 0x236   : > { %1000 = vst.msk [vmem:[#allocation2 + $0x121] sm:$0xff] %vm492_vm1, %v968_v37  ;;  %v906_v60 = vmin.f32 %v874_v25, 6.0  ;;  %v1290_v43 = vadd.f32 %v1258_v42, %v1193_v53  ;;  %v1676_v10 = vadd.f32 %v1644_v8, %v1578_v35  ;;  %v1741_v25 = vmul.f32 %v3520_v13, %v1129_v62 }
 0x237   : > { %v797_v48 = vpop.f32.mrf.mxu1  ;;  %v4089_v50 = vsel %vm492_vm1, %v4075_v28, 0.0  ;;  %v2032_v9 = vmul.f32 0.16666667, %v2000_v30  ;;  %v1162_v41 = vmul.f32 %v3467_v7, %v1129_v62  ;;  %v1066_v12 = vmul.f32 %v3464_v6, %v1033_v19  ;;  %v1227_v19 = vld [vmem:[#allocation2 + $0x112] sm:$0xff] }
 0x238   : > { %v4080_v61 = vadd.f32 %v3864_v29, %v797_v48  ;;  %v938_v4 = vmul.f32 0.16666667, %v906_v60  ;;  %v1579_v48 = vadd.f32 %v1547_v31, %v1482_v22  ;;  %v1773_v37 = vadd.f32 %v1741_v25, %v1676_v10 }
 0x239   : > { %v1163_v53 = vmul.f32 %v3467_v7, %v1130_v63  ;;  %v1387_v8 = vadd.f32 %v1355_v55, %v1290_v43  ;;  %v4099_v42 = vmul.f32 %v2031_v46, %v4014_v36  ;;  %v1386_v45 = vadd.f32 %v1354_v59, %v1289_v40 }
 0x23a   : > { %v970_v26 = vmul.f32 %v938_v4, %v4020_v3  ;;  %v843_v33 = vadd.f32 3.0, %v4080_v61  ;;  %v1677_v5 = vadd.f32 %v1645_v57, %v1579_v48  ;;  %v4101_v3 = vmin.f32 %v1969_v49, 6.0 }
 0x23b   : > { %4704 = vst [vmem:[#allocation36_spill] sm:$0xff] %v4099_v42  ;;  %v1870_v35 = vadd.f32 %v1838_v23, %v1773_v37  ;;  %v4104_v24 = vmul.f32 %v2032_v9, %v4032_v2  ;;  %v1451_v22 = vmul.f32 %v3489_v44, %v1129_v62  ;;  %v1452_v30 = vmul.f32 %v3489_v44, %v1130_v63 }
 0x23c   : > { %1002 = vst.msk [vmem:[#allocation2 + $0x139] sm:$0xff] %vm492_vm1, %v970_v26  ;;  %v1742_v43 = vmul.f32 %v3520_v13, %v1130_v63  ;;  %v1194_v31 = vadd.f32 %v1162_v41, %v1065_v1  ;;  %v1259_v10 = vmul.f32 %v3474_v16, %v1226_v0  ;;  %v875_v46 = vmax.f32 %v843_v33, 0.0  ;;  %v1132_v41 = vld [vmem:[#allocation2 + $0x129] sm:$0xff] }
 0x23d   : > { %v1034_v55 = vld [vmem:[#allocation2 + $0x120] sm:$0xff]  ;;  %v1195_v40 = vadd.f32 %v1163_v53, %v1066_v12  ;;  %v1484_v4 = vadd.f32 %v1452_v30, %v1387_v8  ;;  %v1548_v2 = vmul.f32 %v3492_v47, %v1226_v0  ;;  %v1483_v62 = vadd.f32 %v1451_v22, %v1386_v45  ;;  %v1035_v26 = vld [vmem:[#allocation2 + $0x128] sm:$0xff] }
 0x23e   : > { %v1131_v36 = vld [vmem:[#allocation2 + $0x121] sm:$0xff]  ;;  %v1774_v49 = vadd.f32 %v1742_v43, %v1677_v5  ;;  %v1260_v59 = vmul.f32 %v3474_v16, %v1227_v19  ;;  %v1549_v25 = vmul.f32 %v3492_v47, %v1227_v19  ;;  %v4117_v63 = vadd.f32 %v4011_v54, %v1870_v35  ;;  %v1229_v43 = vld [vmem:[#allocation2 + $0x12a] sm:$0xff] }
 0x23f   : > { %v800_v20 = vpop.f32.mrf.mxu1  ;;  %v1839_v23 = vmul.f32 %v3523_v18, %v1227_v19  ;;  %v1067_v48 = vmul.f32 %v3464_v6, %v1034_v55  ;;  %v1356_v9 = vmul.f32 %v3480_v27, %v1034_v55  ;;  %v1291_v1 = vadd.f32 %v1259_v10, %v1194_v31  ;;  %v1228_v30 = vld [vmem:[#allocation2 + $0x122] sm:$0xff] }
 0x240   : > { %v4111_v57 = vadd.f32 %v3864_v29, %v800_v20  ;;  %4705 = vst [vmem:[#allocation37_spill] sm:$0xff] %v4117_v63  ;;  %v1164_v20 = vmul.f32 %v3467_v7, %v1131_v36  ;;  %v1646_v0 = vmul.f32 %v3497_v56, %v1034_v55  ;;  %v907_v37 = vmin.f32 %v875_v46, 6.0 }
 0x241   : > { %v1292_v12 = vadd.f32 %v1260_v59, %v1195_v40  ;;  %v1580_v53 = vadd.f32 %v1548_v2, %v1483_v62  ;;  %v1581_v8 = vadd.f32 %v1549_v25, %v1484_v4  ;;  %v1871_v5 = vadd.f32 %v1839_v23, %v1774_v49 }
 0x242   : > { %v844_v33 = vadd.f32 3.0, %v4111_v57  ;;  %v4126_v35 = vadd.f32 3.0, %v4117_v63  ;;  %v1453_v22 = vmul.f32 %v3489_v44, %v1131_v36  ;;  %v1743_v19 = vmul.f32 %v3520_v13, %v1131_v36 }
 0x243   : > { %v1647_v31 = vmul.f32 %v3497_v56, %v1035_v26  ;;  %v1196_v10 = vadd.f32 %v1164_v20, %v1067_v48  ;;  %v1388_v55 = vadd.f32 %v1356_v9, %v1291_v1  ;;  %v1068_v46 = vmul.f32 %v3464_v6, %v1035_v26  ;;  %v2150_v1 = vld [vmem:[%s4642_s5] sm:$0xff] }
 0x244   : > { %v1165_v40 = vmul.f32 %v3467_v7, %v1132_v41  ;;  %v1678_v4 = vadd.f32 %v1646_v0, %v1580_v53  ;;  %v939_v2 = vmul.f32 0.16666667, %v907_v37  ;;  %v876_v49 = vmax.f32 %v844_v33, 0.0  ;;  %2171 = vmatpush.msrb.mxu1 %v2150_v1 }
 0x245   : > { %v1261_v59 = vmul.f32 %v3474_v16, %v1228_v30  ;;  %v1262_v25 = vmul.f32 %v3474_v16, %v1229_v43  ;;  %v1357_v36 = vmul.f32 %v3480_v27, %v1035_v26  ;;  %v1679_v28 = vadd.f32 %v1647_v31, %v1581_v8 }
 0x246   : > { %v971_v48 = vmul.f32 %v939_v2, %v4080_v61  ;;  %v908_v20 = vmin.f32 %v876_v49, 6.0  ;;  %v1485_v0 = vadd.f32 %v1453_v22, %v1388_v55  ;;  %v1197_v37 = vadd.f32 %v1165_v40, %v1068_v46  ;;  %v1036_v49 = vld [vmem:[#allocation2 + $0x138] sm:$0xff] }
 0x247   : > { %v803_v60 = vpop.f32.mrf.mxu1  ;;  %v1454_v53 = vmul.f32 %v3489_v44, %v1132_v41  ;;  %v1744_v26 = vmul.f32 %v3520_v13, %v1132_v41  ;;  %v1389_v31 = vadd.f32 %v1357_v36, %v1292_v12  ;;  %v1550_v2 = vmul.f32 %v3492_v47, %v1228_v30 }
 0x248   : > { %v804_v62 = vadd.f32 %v3864_v29, %v803_v60  ;;  %v1840_v60 = vmul.f32 %v3523_v18, %v1228_v30  ;;  %1003 = vst.msk [vmem:[#allocation2 + $0x141] sm:$0xff] %vm492_vm1, %v971_v48  ;;  %v940_v8 = vmul.f32 0.16666667, %v908_v20  ;;  %v1293_v38 = vadd.f32 %v1261_v59, %v1196_v10  ;;  %v1133_v20 = vld [vmem:[#allocation2 + $0x139] sm:$0xff] }
 0x249   : > { %v1776_v55 = vadd.f32 %v1744_v26, %v1679_v28  ;;  %v1841_v41 = vmul.f32 %v3523_v18, %v1229_v43  ;;  %v1648_v12 = vmul.f32 %v3497_v56, %v1036_v49  ;;  %v1486_v28 = vadd.f32 %v1454_v53, %v1389_v31 }
 0x24a   : > { %v845_v9 = vadd.f32 3.0, %v804_v62  ;;  %v972_v46 = vmul.f32 %v940_v8, %v4111_v57  ;;  %v1551_v57 = vmul.f32 %v3492_v47, %v1229_v43  ;;  %v1582_v36 = vadd.f32 %v1550_v2, %v1485_v0 }
 0x24b   : > { %v1069_v10 = vmul.f32 %v3464_v6, %v1036_v49  ;;  %v2033_v43 = vmul.f32 0.16666667, %v4101_v3  ;;  %v1294_v0 = vadd.f32 %v1262_v25, %v1197_v37  ;;  %v1455_v31 = vmul.f32 %v3489_v44, %v1133_v20 }
 0x24c   : > { %v877_v61 = vmax.f32 %v845_v9, 0.0  ;;  %1004 = vst.msk [vmem:[#allocation2 + $0x151] sm:$0xff] %vm492_vm1, %v972_v46  ;;  %v1680_v53 = vadd.f32 %v1648_v12, %v1582_v36  ;;  %v1745_v3 = vmul.f32 %v3520_v13, %v1133_v20  ;;  %v1970_v25 = vmax.f32 %v4126_v35, 0.0 }
 0x24e   : > { %v909_v40 = vmin.f32 %v877_v61, 6.0 }
 0x24f   : > { %v806_v45 = vpop.f32.mrf.mxu1  ;;  %v1134_v2 = vld [vmem:[#allocation2 + $0x141] sm:$0xff] }
 0x250   : > { %v807_v23 = vadd.f32 %v3864_v29, %v806_v45  ;;  %v1775_v45 = vadd.f32 %v1743_v19, %v1678_v4  ;;  %v1358_v19 = vmul.f32 %v3480_v27, %v1036_v49  ;;  %v941_v30 = vmul.f32 0.16666667, %v909_v40  ;;  %v1230_v49 = vld [vmem:[#allocation2 + $0x13a] sm:$0xff] }
 0x251   : > { %v1263_v12 = vmul.f32 %v3474_v16, %v1230_v49  ;;  %v4239_v32 = vmul.f32 %v3523_v18, %v1230_v49 }
 0x252   : > { %v846_v33 = vadd.f32 3.0, %v807_v23  ;;  %v1872_v51 = vadd.f32 %v1840_v60, %v1775_v45  ;;  %v973_v59 = vmul.f32 %v941_v30, %v804_v62  ;;  %v1166_v60 = vmul.f32 %v3467_v7, %v1133_v20  ;;  %v4192_v20 = vld [vmem:[#allocation2 + $0x142] sm:$0xff] }
 0x253   : > { %v1390_v45 = vadd.f32 %v1358_v19, %v1293_v38  ;;  %v4166_v62 = vadd.f32 %v4089_v50, %v4068_v39  ;;  %v4174_v38 = vsel %vm492_vm1, %v4099_v42, 0.0  ;;  %v4194_v19 = vadd.f32 %v1745_v3, %v1680_v53  ;;  %v4201_v36 = vld [vmem:[#allocation2 + $0x151] sm:$0xff] }
 0x254   : > { %v878_v34 = vmax.f32 %v846_v33, 0.0  ;;  %v1873_v33 = vadd.f32 %v1841_v41, %v1776_v55  ;;  %v4160_v61 = vadd.f32 %v4011_v54, %v1872_v51  ;;  %1005 = vst.msk [vmem:[#allocation2 + $0x159] sm:$0xff] %vm492_vm1, %v973_v59  ;;  %v1198_v37 = vadd.f32 %v1166_v60, %v1069_v10 }
 0x255   : > { %v4188_v40 = vadd.f32 %v1455_v31, %v1390_v45  ;;  %v4207_v59 = vmin.f32 %v1970_v25, 6.0  ;;  %v1456_v45 = vmul.f32 %v3489_v44, %v1134_v2  ;;  %v1552_v53 = vmul.f32 %v3492_v47, %v1230_v49 }
 0x256   : > { %v910_v48 = vmin.f32 %v878_v34, 6.0  ;;  %v4156_v34 = vadd.f32 %v4011_v54, %v1871_v5  ;;  %4707 = vst [vmem:[#allocation39_spill] sm:$0xff] %v4160_v61  ;;  %v4168_v5 = vadd.f32 %v1551_v57, %v1486_v28  ;;  %v4178_v39 = vadd.f32 %v4011_v54, %v1873_v33  ;;  %v1038_v57 = vld [vmem:[#allocation2 + $0x150] sm:$0xff] }
 0x257   : > { %v809_v22 = vpop.f32.mrf.mxu1  ;;  %v4186_v46 = vadd.f32 3.0, %v4160_v61  ;;  %v1264_v33 = vmul.f32 %v3474_v16, %v4192_v20  ;;  %v1071_v3 = vmul.f32 %v3464_v6, %v1038_v57  ;;  %v4236_v10 = vmul.f32 %v3520_v13, %v1134_v2 }
 0x258   : > { %v810_v1 = vadd.f32 %v3864_v29, %v809_v22  ;;  %v942_v9 = vmul.f32 0.16666667, %v910_v48  ;;  %4706 = vst [vmem:[#allocation38_spill] sm:$0xff] %v4156_v34  ;;  %v4181_v50 = vadd.f32 3.0, %v4156_v34  ;;  %v1167_v48 = vmul.f32 %v3467_v7, %v1134_v2 }
 0x259   : > { %4708 = vst [vmem:[#allocation40_spill] sm:$0xff] %v4178_v39  ;;  %v1457_v49 = vmul.f32 %v3489_v44, %v4201_v36  ;;  %v1650_v17 = vmul.f32 %v3497_v56, %v1038_v57 }
 0x25a   : > { %v847_v4 = vadd.f32 3.0, %v810_v1  ;;  %v974_v26 = vmul.f32 %v942_v9, %v807_v23  ;;  %v1037_v23 = vld [vmem:[#allocation2 + $0x140] sm:$0xff]  ;;  %v4204_v9 = vadd.f32 3.0, %v4178_v39 }
 0x25b   : > { %v1070_v41 = vmul.f32 %v3464_v6, %v1037_v23  ;;  %v1359_v28 = vmul.f32 %v3480_v27, %v1037_v23  ;;  %v4218_v31 = vld [vmem:[#allocation2 + $0x152] sm:$0xff]  ;;  %v4256_v11 = vld [vmem:[#allocation2 + $0x15a] sm:$0xff] }
 0x25c   : > { %v879_v8 = vmax.f32 %v847_v4, 0.0  ;;  %1006 = vst.msk [vmem:[#allocation2 + $0x169] sm:$0xff] %vm492_vm1, %v974_v26  ;;  %v4198_v4 = vmul.f32 %v2033_v43, %v4061_v58  ;;  %v4216_v43 = vmul.f32 %v3492_v47, %v4192_v20  ;;  %v4223_v25 = vld [vmem:[#allocation2 + $0x158] sm:$0xff]  ;;  %v1360_v58 = vmul.f32 %v3480_v27, %v1038_v57 }
 0x25e   : > { %v911_v22 = vmin.f32 %v879_v8, 6.0  ;;  %4709 = vst [vmem:[#allocation41_spill] sm:$0xff] %v4198_v4  ;;  %v1199_v8 = vadd.f32 %v1167_v48, %v1070_v41 }
 0x25f   : > { %v812_v51 = vpop.f32.mrf.mxu1 }
 0x260   : > { %v813_v55 = vadd.f32 %v3864_v29, %v812_v51  ;;  %v943_v35 = vmul.f32 0.16666667, %v911_v22  ;;  %v1295_v51 = vadd.f32 %v1263_v12, %v1198_v37  ;;  %v4225_v22 = vld [vmem:[#allocation2 + $0x159] sm:$0xff]  ;;  %v1296_v15 = vadd.f32 %v1264_v33, %v1199_v8 }
 0x261   : > { %v1624_v33 = vld [vmem:[#allocation2 + $0x1a0] sm:$0xff] }
 0x262   : > { %v848_v30 = vadd.f32 3.0, %v813_v55  ;;  %v975_v60 = vmul.f32 %v943_v35, %v810_v1  ;;  %v1168_v1 = vmul.f32 %v3467_v7, %v4201_v36  ;;  %v1391_v35 = vadd.f32 %v1359_v28, %v1294_v0 }
 0x263   : > { %v4232_v37 = vld [vmem:[#allocation2 + $0x168] sm:$0xff]  ;;  %v1072_v0 = vmul.f32 %v3464_v6, %v4223_v25  ;;  %v1361_v28 = vmul.f32 %v3480_v27, %v4223_v25  ;;  %v1392_v42 = vadd.f32 %v1360_v58, %v1295_v51  ;;  %v1266_v58 = vmul.f32 %v3474_v16, %v4256_v11 }
 0x264   : > { %v880_v26 = vmax.f32 %v848_v30, 0.0  ;;  %1007 = vst.msk [vmem:[#allocation2 + $0x171] sm:$0xff] %vm492_vm1, %v975_v60  ;;  %v4229_v30 = vmul.f32 %v3497_v56, %v1037_v23  ;;  %v1265_v60 = vmul.f32 %v3474_v16, %v4218_v31  ;;  %v1169_v23 = vmul.f32 %v3467_v7, %v4225_v22 }
 0x265   : > { %v1200_v21 = vadd.f32 %v1168_v1, %v1071_v3  ;;  %v1073_v39 = vmul.f32 %v3464_v6, %v4232_v37  ;;  %v1488_v1 = vadd.f32 %v1456_v45, %v1391_v35  ;;  %v1393_v34 = vadd.f32 %v1361_v28, %v1296_v15 }
 0x266   : > { %v912_v41 = vmin.f32 %v880_v26, 6.0  ;;  %v1201_v57 = vadd.f32 %v1169_v23, %v1072_v0  ;;  %v1458_v51 = vmul.f32 %v3489_v44, %v4225_v22  ;;  %v4281_v0 = vmul.f32 %v3497_v56, %v1624_v33 }
 0x267   : > { %v815_v48 = vpop.f32.mrf.mxu1  ;;  %v1297_v3 = vadd.f32 %v1265_v60, %v1200_v21  ;;  %v1554_v60 = vmul.f32 %v3492_v47, %v4218_v31  ;;  %v1489_v28 = vadd.f32 %v1457_v49, %v1392_v42 }
 0x268   : > { %v816_v12 = vadd.f32 %v3864_v29, %v815_v48  ;;  %v944_v26 = vmul.f32 0.16666667, %v912_v41  ;;  %v4249_v29 = vld [vmem:[#allocation2 + $0x169] sm:$0xff]  ;;  %v1362_v41 = vmul.f32 %v3480_v27, %v4232_v37  ;;  %v1298_v23 = vadd.f32 %v1266_v58, %v1201_v57 }
 0x269   : > { %v1586_v49 = vadd.f32 %v1554_v60, %v1489_v28  ;;  %v1652_v57 = vmul.f32 %v3497_v56, %v4232_v37 }
 0x26a   : > { %v849_v2 = vadd.f32 3.0, %v816_v12  ;;  %v976_v48 = vmul.f32 %v944_v26, %v813_v55  ;;  %v1170_v55 = vmul.f32 %v3467_v7, %v4249_v29  ;;  %v1394_v8 = vadd.f32 %v1362_v41, %v1297_v3 }
 0x26b   : > { %v1041_v4 = vld [vmem:[#allocation2 + $0x170] sm:$0xff] }
 0x26c   : > { %v881_v52 = vmax.f32 %v849_v2, 0.0  ;;  %1008 = vst.msk [vmem:[#allocation2 + $0x181] sm:$0xff] %vm492_vm1, %v976_v48  ;;  %v1138_v61 = vld [vmem:[#allocation2 + $0x171] sm:$0xff]  ;;  %v1584_v2 = vadd.f32 %v1552_v53, %v4188_v40  ;;  %v4269_v48 = vmul.f32 %v3497_v56, %v1623_v14  ;;  %v1363_v15 = vmul.f32 %v3480_v27, %v1041_v4 }
 0x26d   : > { %v1171_v45 = vmul.f32 %v3467_v7, %v1138_v61  ;;  %v4273_v35 = vld [vmem:[#allocation2 + $0x16a] sm:$0xff]  ;;  %v1202_v40 = vadd.f32 %v1170_v55, %v1073_v39  ;;  %v1459_v53 = vmul.f32 %v3489_v44, %v4249_v29  ;;  %v4283_v41 = vld [vmem:[#allocation2 + $0x172] sm:$0xff]  ;;  %v1555_v39 = vmul.f32 %v3492_v47, %v4256_v11 }
 0x26e   : > { %v913_v26 = vmin.f32 %v881_v52, 6.0  ;;  %v1074_v52 = vmul.f32 %v3464_v6, %v1041_v4  ;;  %v1490_v6 = vadd.f32 %v1458_v51, %v1393_v34  ;;  %v1267_v7 = vmul.f32 %v3474_v16, %v4273_v35 }
 0x26f   : > { %v1491_v3 = vadd.f32 %v1459_v53, %v1394_v8  ;;  %v1585_v55 = vadd.f32 %v4216_v43, %v1488_v1  ;;  %v1395_v63 = vadd.f32 %v1363_v15, %v1298_v23  ;;  %v1556_v42 = vmul.f32 %v3492_v47, %v4273_v35 }
 0x270   : > { %v945_v21 = vmul.f32 0.16666667, %v913_v26  ;;  %v1203_v26 = vadd.f32 %v1171_v45, %v1074_v52  ;;  %v1651_v34 = vmul.f32 %v3497_v56, %v4223_v25  ;;  %v1653_v58 = vmul.f32 %v3497_v56, %v1041_v4 }
 0x271   : > { %v1268_v43 = vmul.f32 %v3474_v16, %v4283_v41  ;;  %v1460_v1 = vmul.f32 %v3489_v44, %v1138_v61  ;;  %v1587_v8 = vadd.f32 %v1555_v39, %v1490_v6  ;;  %v1681_v51 = vadd.f32 %v4229_v30, %v4168_v5  ;;  %v1720_v16 = vld [vmem:[#allocation2 + $0x199] sm:$0xff] }
 0x272   : > { %v977_v14 = vmul.f32 %v945_v21, %v816_v12  ;;  %v1299_v21 = vadd.f32 %v1267_v7, %v1202_v40  ;;  %v1557_v25 = vmul.f32 %v3492_v47, %v4283_v41  ;;  %v1682_v52 = vadd.f32 %v1650_v17, %v1584_v2 }
 0x273   : > { %v1331_v33 = vld [vmem:[#allocation2 + $0x180] sm:$0xff]  ;;  %v1747_v45 = vmul.f32 %v3520_v13, %v4201_v36  ;;  %v1300_v37 = vadd.f32 %v1268_v43, %v1203_v26  ;;  %v1492_v4 = vadd.f32 %v1460_v1, %v1395_v63  ;;  %v1588_v53 = vadd.f32 %v1556_v42, %v1491_v3 }
 0x274   : > { %1009 = vst.msk [vmem:[#allocation2 + $0x189] sm:$0xff] %vm492_vm1, %v977_v14  ;;  %v1364_v12 = vmul.f32 %v3480_v27, %v1331_v33  ;;  %v1428_v15 = vld [vmem:[#allocation2 + $0x181] sm:$0xff]  ;;  %v1683_v60 = vadd.f32 %v1651_v34, %v1585_v55  ;;  %v1684_v23 = vadd.f32 %v1652_v57, %v1586_v49  ;;  %v1685_v28 = vadd.f32 %v1653_v58, %v1587_v8 }
 0x275   : > { %v1748_v5 = vmul.f32 %v3520_v13, %v4225_v22  ;;  %v1654_v30 = vmul.f32 %v3497_v56, %v1331_v33  ;;  %v1749_v17 = vmul.f32 %v3520_v13, %v4249_v29  ;;  %v1750_v2 = vmul.f32 %v3520_v13, %v1138_v61 }
 0x276   : > { %v1396_v14 = vadd.f32 %v1364_v12, %v1299_v21  ;;  %v1778_v36 = vadd.f32 %v4236_v10, %v1681_v51  ;;  %v1461_v6 = vmul.f32 %v3489_v44, %v1428_v15  ;;  %v1753_v3 = vmul.f32 %v3520_v13, %v1720_v16 }
 0x277   : > { %v1843_v39 = vmul.f32 %v3523_v18, %v4192_v20  ;;  %v1844_v22 = vmul.f32 %v3523_v18, %v4218_v31  ;;  %v1874_v10 = vadd.f32 %v4239_v32, %v4194_v19  ;;  %v1589_v42 = vadd.f32 %v1557_v25, %v1492_v4 }
 0x278   : > { %v1493_v26 = vadd.f32 %v1461_v6, %v1396_v14  ;;  %v1779_v34 = vadd.f32 %v1747_v45, %v1682_v52  ;;  %v1780_v12 = vadd.f32 %v1748_v5, %v1683_v60  ;;  %v1686_v57 = vadd.f32 %v1654_v30, %v1588_v53  ;;  %v1817_v53 = vld [vmem:[#allocation2 + $0x19a] sm:$0xff] }
 0x279   : > { %v1875_v58 = vadd.f32 %v1843_v39, %v1778_v36  ;;  %v4333_v8 = vadd.f32 %v4011_v54, %v1874_v10  ;;  %v1782_v21 = vadd.f32 %v1750_v2, %v1685_v28  ;;  %v1751_v45 = vmul.f32 %v3520_v13, %v1428_v15 }
 0x27a   : > { %v1876_v19 = vadd.f32 %v1844_v22, %v1779_v34  ;;  %v1973_v15 = vmax.f32 %v4204_v9, 0.0  ;;  %v1818_v9 = vld [vmem:[#allocation2 + $0x1a2] sm:$0xff] }
 0x27b   : > { %v1332_v40 = vld [vmem:[#allocation2 + $0x188] sm:$0xff]  ;;  %v1783_v5 = vadd.f32 %v1751_v45, %v1686_v57 }
 0x27c   : > { %v1429_v63 = vld [vmem:[#allocation2 + $0x189] sm:$0xff]  ;;  %v1365_v55 = vmul.f32 %v3480_v27, %v1332_v40  ;;  %v1655_v61 = vmul.f32 %v3497_v56, %v1332_v40  ;;  %v1845_v27 = vmul.f32 %v3523_v18, %v4256_v11  ;;  %v1846_v56 = vmul.f32 %v3523_v18, %v4273_v35 }
 0x27d   : > { %v1525_v7 = vld [vmem:[#allocation2 + $0x182] sm:$0xff]  ;;  %v1526_v33 = vld [vmem:[#allocation2 + $0x18a] sm:$0xff]  ;;  %v1462_v20 = vmul.f32 %v3489_v44, %v1429_v63  ;;  %v1752_v51 = vmul.f32 %v3520_v13, %v1429_v63  ;;  %v1781_v44 = vadd.f32 %v1749_v17, %v1684_v23  ;;  %v1847_v11 = vmul.f32 %v3523_v18, %v4283_v41 }
 0x27e   : > { %v1558_v29 = vmul.f32 %v3492_v47, %v1525_v7  ;;  %v1397_v49 = vadd.f32 %v1365_v55, %v1300_v37  ;;  %v1687_v43 = vadd.f32 %v1655_v61, %v1589_v42  ;;  %v1559_v32 = vmul.f32 %v3492_v47, %v1526_v33  ;;  %v1721_v37 = vld [vmem:[#allocation2 + $0x1a1] sm:$0xff] }
 0x27f   : > { %v1877_v25 = vadd.f32 %v1845_v27, %v1780_v12  ;;  %v4340_v35 = vadd.f32 %v4011_v54, %v1875_v58  ;;  %v1848_v60 = vmul.f32 %v3523_v18, %v1525_v7  ;;  %v1878_v16 = vadd.f32 %v1846_v56, %v1781_v44  ;;  %v4712_v56 = vld [vmem:[#allocation37_spill] sm:$0xff] }
 0x280   : > { %v1590_v31 = vadd.f32 %v1558_v29, %v1493_v26  ;;  %v1494_v1 = vadd.f32 %v1462_v20, %v1397_v49  ;;  %v1784_v4 = vadd.f32 %v1752_v51, %v1687_v43  ;;  %v4345_v14 = vadd.f32 %v4011_v54, %v1876_v19 }
 0x281   : > { %v1942_v23 = vadd.f32 3.0, %v4333_v8  ;;  %v4710_v41 = vmax.f32 %v4181_v50, 0.0  ;;  %v1849_v30 = vmul.f32 %v3523_v18, %v1526_v33  ;;  %v4353_v17 = vadd.f32 %v4011_v54, %v1877_v25 }
 0x282   : > { %v1591_v52 = vadd.f32 %v1559_v32, %v1494_v1  ;;  %v1688_v47 = vadd.f32 %v4269_v48, %v1590_v31  ;;  %v1879_v48 = vadd.f32 %v1847_v11, %v1782_v21  ;;  %v1754_v36 = vmul.f32 %v3520_v13, %v1721_v37  ;;  %v4713_v32 = vld [vmem:[#allocation38_spill] sm:$0xff]  ;;  %v4714_v37 = vld [vmem:[#allocation39_spill] sm:$0xff] }
 0x283   : > { %v2003_v28 = vmin.f32 %v4710_v41, 6.0  ;;  %v1850_v40 = vmul.f32 %v3523_v18, %v1817_v53  ;;  %v1943_v63 = vadd.f32 3.0, %v4340_v35  ;;  %v1880_v7 = vadd.f32 %v1848_v60, %v1783_v5  ;;  %v4715_v53 = vld [vmem:[#allocation41_spill] sm:$0xff] }
 0x284   : > { %v1689_v2 = vadd.f32 %v4281_v0, %v1591_v52  ;;  %v1785_v6 = vadd.f32 %v1753_v3, %v1688_v47  ;;  %v1881_v50 = vadd.f32 %v1849_v30, %v1784_v4  ;;  %v4360_v39 = vadd.f32 %v4011_v54, %v1878_v16  ;;  %v4716_v30 = vld [vmem:[#allocation40_spill] sm:$0xff] }
 0x285   : > { %v1944_v22 = vadd.f32 3.0, %v4345_v14  ;;  %v1974_v55 = vmax.f32 %v1942_v23, 0.0  ;;  %v4711_v29 = vmax.f32 %v4186_v46, 0.0  ;;  %v2034_v0 = vmul.f32 0.16666667, %v4207_v59 }
 0x286   : > { %v4367_v13 = vadd.f32 %v4011_v54, %v1879_v48  ;;  %v1945_v10 = vadd.f32 3.0, %v4353_v17  ;;  %v2005_v3 = vmin.f32 %v1973_v15, 6.0  ;;  %v2035_v26 = vmul.f32 0.16666667, %v2003_v28 }
 0x287   : > { %v2004_v61 = vmin.f32 %v4711_v29, 6.0  ;;  %v1786_v33 = vadd.f32 %v1754_v36, %v1689_v2  ;;  %v1851_v42 = vmul.f32 %v3523_v18, %v1818_v9  ;;  %v1975_v34 = vmax.f32 %v1943_v63, 0.0 }
 0x288   : > { %v2111_v12 = vsel %vm492_vm1, %v4104_v24, 0.0  ;;  %v1882_v49 = vadd.f32 %v1850_v40, %v1785_v6  ;;  %v4374_v46 = vadd.f32 %v4011_v54, %v1880_v7  ;;  %v4377_v59 = vadd.f32 %v4011_v54, %v1881_v50 }
 0x289   : > { %v1946_v20 = vadd.f32 3.0, %v4360_v39  ;;  %v1976_v57 = vmax.f32 %v1944_v22, 0.0  ;;  %v2006_v58 = vmin.f32 %v1974_v55, 6.0  ;;  %v2036_v31 = vmul.f32 0.16666667, %v2004_v61 }
 0x28a   : > { %v2110_v43 = vadd.f32 %v4174_v38, %v4166_v62  ;;  %v1947_v18 = vadd.f32 3.0, %v4367_v13  ;;  %v1977_v27 = vmax.f32 %v1945_v10, 0.0  ;;  %v4384_v1 = vmul.f32 %v2034_v0, %v4712_v56 }
 0x28b   : > { %v4387_v19 = vmul.f32 %v2035_v26, %v4713_v32  ;;  %v1883_v51 = vadd.f32 %v1851_v42, %v1786_v33  ;;  %v2007_v44 = vmin.f32 %v1975_v34, 6.0  ;;  %v2037_v21 = vmul.f32 0.16666667, %v2005_v3 }
 0x28c   : > { %v2112_v25 = vadd.f32 %v2111_v12, %v2110_v43  ;;  %v1918_v52 = vadd.f32 %v4011_v54, %v1882_v49  ;;  %v1948_v45 = vadd.f32 3.0, %v4374_v46  ;;  %v1949_v11 = vadd.f32 3.0, %v4377_v59 }
 0x28d   : > { %v1978_v62 = vmax.f32 %v1946_v20, 0.0  ;;  %v2008_v38 = vmin.f32 %v1976_v57, 6.0  ;;  %v2038_v47 = vmul.f32 0.16666667, %v2006_v58  ;;  %v4393_v4 = vmul.f32 %v2036_v31, %v4714_v37 }
 0x28e   : > { %v2113_v60 = vsel %vm492_vm1, %v4715_v53, 0.0  ;;  %v1979_v16 = vmax.f32 %v1947_v18, 0.0  ;;  %v2009_v23 = vmin.f32 %v1977_v27, 6.0  ;;  %v2115_v41 = vsel %vm492_vm1, %v4384_v1, 0.0 }
 0x28f   : > { %v2114_v15 = vadd.f32 %v2113_v60, %v2112_v25  ;;  %v1919_v28 = vadd.f32 %v4011_v54, %v1883_v51  ;;  %v2039_v5 = vmul.f32 0.16666667, %v2007_v44  ;;  %v4401_v48 = vmul.f32 %v2037_v21, %v4716_v30 }
 0x290   : > { %v2117_v2 = vsel %vm492_vm1, %v4387_v19, 0.0  ;;  %v1950_v36 = vadd.f32 3.0, %v1918_v52  ;;  %v1980_v40 = vmax.f32 %v1948_v45, 0.0  ;;  %v2010_v6 = vmin.f32 %v1978_v62, 6.0 }
 0x291   : > { %v2116_v63 = vadd.f32 %v2115_v41, %v2114_v15  ;;  %v2040_v9 = vmul.f32 0.16666667, %v2008_v38  ;;  %v4406_v7 = vmul.f32 %v2038_v47, %v4333_v8  ;;  %v2119_v50 = vsel %vm492_vm1, %v4393_v4, 0.0 }
 0x292   : > { %v1981_v22 = vmax.f32 %v1949_v11, 0.0  ;;  %v2011_v54 = vmin.f32 %v1979_v16, 6.0  ;;  %v1951_v29 = vadd.f32 3.0, %v1919_v28  ;;  %v2041_v61 = vmul.f32 0.16666667, %v2009_v23 }
 0x293   : > { %v2118_v55 = vadd.f32 %v2117_v2, %v2116_v63  ;;  %v4411_v0 = vmul.f32 %v2039_v5, %v4340_v35  ;;  %v2121_v10 = vsel %vm492_vm1, %v4401_v48, 0.0  ;;  %v2012_v3 = vmin.f32 %v1980_v40, 6.0 }
 0x294   : > { %v1982_v33 = vmax.f32 %v1950_v36, 0.0  ;;  %v2042_v42 = vmul.f32 0.16666667, %v2010_v6  ;;  %v4416_v8 = vmul.f32 %v2040_v9, %v4345_v14  ;;  %v2123_v34 = vsel %vm492_vm1, %v4406_v7, 0.0 }
 0x295   : > { %v2120_v26 = vadd.f32 %v2119_v50, %v2118_v55  ;;  %v2013_v12 = vmin.f32 %v1981_v22, 6.0  ;;  %v1983_v20 = vmax.f32 %v1951_v29, 0.0  ;;  %v2043_v57 = vmul.f32 0.16666667, %v2011_v54  ;;  %v2177_v50 = vld [vmem:[#allocation12] sm:$0xff] }
 0x296   : > { %v4421_v35 = vmul.f32 %v2041_v61, %v4353_v17  ;;  %v2125_v58 = vsel %vm492_vm1, %v4411_v0, 0.0  ;;  %v2014_v43 = vmin.f32 %v1982_v33, 6.0  ;;  %v2044_v18 = vmul.f32 0.16666667, %v2012_v3  ;;  %2197 = vmatpush.msra.mxu2 %v2177_v50  ;;  %v2152_v22 = vld [vmem:[#allocation11] sm:$0x1] }
 0x297   : > { %v2122_v49 = vadd.f32 %v2121_v10, %v2120_v26  ;;  %v4426_v27 = vmul.f32 %v2042_v42, %v4360_v39  ;;  %v2127_v14 = vsel %vm492_vm1, %v4416_v8, 0.0  ;;  %v2015_v32 = vmin.f32 %v1983_v20, 6.0  ;;  %v2240_v61 = vld [vmem:[%s4646_s9 + $0x8] sm:$0xff]  ;;  %v2239_v10 = vld [vmem:[%s4646_s9] sm:$0xff] }
 0x298   : > { %v2045_v51 = vmul.f32 0.16666667, %v2013_v12  ;;  %v4431_v44 = vmul.f32 %v2043_v57, %v4367_v13  ;;  %v2129_v17 = vsel %vm492_vm1, %v4421_v35, 0.0  ;;  %v2046_v25 = vmul.f32 0.16666667, %v2014_v43  ;;  %2355 = vmatpush.msrb.mxu2 %v2240_v61  ;;  %2763 = vmatpush.msra.mxu3 %v2240_v61  ;;  %v4717_v57 = vld [vmem:[#allocation21_spill] sm:$0xff] }
 0x299   : > { %v2124_v31 = vadd.f32 %v2123_v34, %v2122_v49  ;;  %v4436_v45 = vmul.f32 %v2044_v18, %v4374_v46  ;;  %v2131_v39 = vsel %vm492_vm1, %v4426_v27, 0.0  ;;  %v2047_v62 = vmul.f32 0.16666667, %v2015_v32  ;;  %v2178_v3 = vld [vmem:[#allocation14] sm:$0x1]  ;;  %v4719_v18 = vld [vmem:[#allocation22_spill] sm:$0xff] }
 0x29a   : > { %v4441_v38 = vmul.f32 %v2045_v51, %v4377_v59  ;;  %v2133_v13 = vsel %vm492_vm1, %v4431_v44, 0.0  ;;  %v4445_v37 = vmul.f32 %v2046_v25, %v1918_v52  ;;  %2356 = vmatpush.msrb.mxu2 %v2239_v10  ;;  %2764 = vmatpush.msra.mxu3 %v2239_v10  ;;  %v4720_v32 = vld [vmem:[#allocation23_spill] sm:$0xff] }
 0x29b   : > { %v2126_v56 = vadd.f32 %v2125_v58, %v2124_v31  ;;  %v2135_v60 = vsel %vm492_vm1, %v4436_v45, 0.0  ;;  %v4449_v46 = vmul.f32 %v2047_v62, %v1919_v28  ;;  %v4718_v31 = vld [vmem:[#allocation36_spill] sm:$0xff]  ;;  %v4723_v62 = vld [vmem:[#allocation26_spill] sm:$0xff] }
 0x29c   : > { %v2137_v23 = vsel %vm492_vm1, %v4441_v38, 0.0  ;;  %v2139_v59 = vsel %vm492_vm1, %v4445_v37, 0.0 }
 0x29d   : > { %v2128_v21 = vadd.f32 %v2127_v14, %v2126_v56  ;;  %v2141_v5 = vsel %vm492_vm1, %v4449_v46, 0.0 }
 0x29f   : > { %v2130_v11 = vadd.f32 %v2129_v17, %v2128_v21  ;;  %v4721_v21 = vld [vmem:[#allocation24_spill] sm:$0xff] }
 0x2a1   : > { %v2132_v47 = vadd.f32 %v2131_v39, %v2130_v11  ;;  %v4722_v39 = vld [vmem:[#allocation25_spill] sm:$0xff] }
 0x2a3   : > { %v2134_v16 = vadd.f32 %v2133_v13, %v2132_v47  ;;  %v4724_v47 = vld [vmem:[#allocation27_spill] sm:$0xff] }
 0x2a5   : > { %v2136_v15 = vadd.f32 %v2135_v60, %v2134_v16  ;;  %v4725_v16 = vld [vmem:[#allocation28_spill] sm:$0xff] }
 0x2a7   : > { %v2138_v41 = vadd.f32 %v2137_v23, %v2136_v15  ;;  %v4726_v15 = vld [vmem:[#allocation29_spill] sm:$0xff] }
 0x2a9   : > { %v2140_v30 = vadd.f32 %v2139_v59, %v2138_v41  ;;  %v4727_v41 = vld [vmem:[#allocation30_spill] sm:$0xff] }
 0x2ab   : > { %v2142_v52 = vadd.f32 %v2141_v5, %v2140_v30  ;;  %v4728_v30 = vld [vmem:[#allocation31_spill] sm:$0xff] }
 0x2ad   : > { %v2143_v2 = vrot.slane %v2142_v52, 4 }
 0x2af   : > { %v2144_v36 = vadd.f32 %v2143_v2, %v2142_v52  ;;  %v4729_v2 = vld [vmem:[#allocation32_spill] sm:$0xff] }
 0x2b1   : > { %v2145_v40 = vrot.slane %v2144_v36, 2 }
 0x2b3   : > { %v2146_v63 = vadd.f32 %v2145_v40, %v2144_v36  ;;  %v4730_v40 = vld [vmem:[#allocation33_spill] sm:$0xff] }
 0x2b5   : > { %v2147_v6 = vrot.slane %v2146_v63, 1 }
 0x2b7   : > { %v2148_v28 = vadd.f32 %v2147_v6, %v2146_v63  ;;  %v4731_v6 = vld [vmem:[#allocation34_spill] sm:$0xff] }
 0x2b9   : > { %v2149_v9 = vmul.f32 0.00390625, %v2148_v28 }
 0x2bb   : > { %2721 = vmatmul.msk.f32.vlgmr.msrb.gmra.mxu1 %vm492_vm1, %v2149_v9  ;;  %v4732_v9 = vld [vmem:[#allocation35_spill] sm:$0xff] }
 0x338   : > { %v2173_v54 = vpop.f32.mrf.mxu1 }
 0x339   : > { %v2174_v55 = vadd.f32 %v2173_v54, %v2152_v22  ;;  %v4566_v54 = vld [vmem:[%s4647_s10] ss:$0 sm:$0xff] }
 0x33b   : > { %v2176_v29 = vmax.f32 %v2174_v55, 0.0 }
 0x33d   : > { %2722 = vmatmul.msk.f32.vlgmr.msra.gmra.mxu2 %vm608_vm0, %v2176_v29 }
 0x3c0   : > { %v2199_v26 = vpop.f32.mrf.mxu2 }
 0x3c1   : > { %v2200_v33 = vadd.f32 %v2199_v26, %v2178_v3 }
 0x3c3   : > { %v2202_v42 = vadd.f32 3.0, %v2200_v33 }
 0x3c5   : > { %v2203_v34 = vmax.f32 %v2202_v42, 0.0 }
 0x3c7   : > { %v2204_v12 = vmin.f32 %v2203_v34, 6.0 }
 0x3c9   : > { %v2205_v49 = vmul.f32 0.16666667, %v2204_v12 }
 0x3cb   : > { %v4465_v20 = vperm.slane %v2205_v49, 0 }
 0x3cd   : > { %v2207_v58 = vmul.f32 %v4465_v20, %v4717_v57  ;;  %v2222_v43 = vmul.f32 %v4465_v20, %v4718_v31  ;;  %v2208_v14 = vmul.f32 %v4465_v20, %v4719_v18  ;;  %v2223_v56 = vmul.f32 %v4465_v20, %v4104_v24 }
 0x3ce   : > { %v2209_v51 = vmul.f32 %v4465_v20, %v4720_v32  ;;  %v2224_v17 = vmul.f32 %v4465_v20, %v4715_v53  ;;  %v2210_v25 = vmul.f32 %v4465_v20, %v4721_v21  ;;  %v2225_v24 = vmul.f32 %v4465_v20, %v4384_v1 }
 0x3cf   : > { %2723 = vmatmul.msk.f32.vlgmr.msrb.gmra.mxu2 %vm492_vm1, %v2207_v58  ;;  %2738 = vmatmul.msk.f32.vlgmr.msra.gmra.mxu3 %vm492_vm1, %v2222_v43  ;;  %v2211_v11 = vmul.f32 %v4465_v20, %v4722_v39  ;;  %v2226_v53 = vmul.f32 %v4465_v20, %v4387_v19  ;;  %v2212_v13 = vmul.f32 %v4465_v20, %v4723_v62 }
 0x3d0   : > { %v2227_v1 = vmul.f32 %v4465_v20, %v4393_v4  ;;  %v2213_v60 = vmul.f32 %v4465_v20, %v4724_v47  ;;  %v2228_v19 = vmul.f32 %v4465_v20, %v4401_v48  ;;  %v2214_v23 = vmul.f32 %v4465_v20, %v4725_v16 }
 0x3d1   : > { %v2229_v4 = vmul.f32 %v4465_v20, %v4406_v7  ;;  %v2215_v59 = vmul.f32 %v4465_v20, %v4726_v15  ;;  %v2230_v48 = vmul.f32 %v4465_v20, %v4411_v0  ;;  %v2216_v5 = vmul.f32 %v4465_v20, %v4727_v41 }
 0x3d2   : > { %v2231_v7 = vmul.f32 %v4465_v20, %v4416_v8  ;;  %v2217_v52 = vmul.f32 %v4465_v20, %v4728_v30  ;;  %v2232_v0 = vmul.f32 %v4465_v20, %v4421_v35  ;;  %v2218_v36 = vmul.f32 %v4465_v20, %v4729_v2 }
 0x3d3   : > { %v2233_v8 = vmul.f32 %v4465_v20, %v4426_v27  ;;  %v2219_v63 = vmul.f32 %v4465_v20, %v4730_v40  ;;  %v2234_v35 = vmul.f32 %v4465_v20, %v4431_v44  ;;  %v2220_v28 = vmul.f32 %v4465_v20, %v4731_v6 }
 0x3d4   : > { %v2235_v27 = vmul.f32 %v4465_v20, %v4436_v45  ;;  %v2221_v50 = vmul.f32 %v4465_v20, %v4732_v9  ;;  %v2236_v44 = vmul.f32 %v4465_v20, %v4441_v38  ;;  %v2237_v22 = vmul.f32 %v4465_v20, %v4445_v37 }
 0x3d5   : > { %v2238_v45 = vmul.f32 %v4465_v20, %v4449_v46 }
 0x3d7   : > { %2724 = vmatmul.msk.f32.gmra.mxu2 %vm492_vm1, %v2208_v14  ;;  %2739 = vmatmul.msk.f32.gmra.mxu3 %vm492_vm1, %v2223_v56 }
 0x3df   : > { %2725 = vmatmul.msk.f32.gmra.mxu2 %vm492_vm1, %v2209_v51  ;;  %2740 = vmatmul.msk.f32.gmra.mxu3 %vm492_vm1, %v2224_v17 }
 0x3e7   : > { %2726 = vmatmul.msk.f32.gmra.mxu2 %vm492_vm1, %v2210_v25  ;;  %2741 = vmatmul.msk.f32.gmra.mxu3 %vm492_vm1, %v2225_v24 }
 0x3ef   : > { %2727 = vmatmul.msk.f32.gmra.mxu2 %vm492_vm1, %v2211_v11  ;;  %2742 = vmatmul.msk.f32.gmra.mxu3 %vm492_vm1, %v2226_v53 }
 0x3f7   : > { %2728 = vmatmul.msk.f32.gmra.mxu2 %vm492_vm1, %v2212_v13  ;;  %2743 = vmatmul.msk.f32.gmra.mxu3 %vm492_vm1, %v2227_v1 }
 0x3ff   : > { %2729 = vmatmul.msk.f32.gmra.mxu2 %vm492_vm1, %v2213_v60  ;;  %2744 = vmatmul.msk.f32.gmra.mxu3 %vm492_vm1, %v2228_v19 }
 0x407   : > { %2730 = vmatmul.msk.f32.gmra.mxu2 %vm492_vm1, %v2214_v23  ;;  %2745 = vmatmul.msk.f32.gmra.mxu3 %vm492_vm1, %v2229_v4 }
 0x40f   : > { %2731 = vmatmul.msk.f32.gmra.mxu2 %vm492_vm1, %v2215_v59  ;;  %2746 = vmatmul.msk.f32.gmra.mxu3 %vm492_vm1, %v2230_v48 }
 0x417   : > { %2732 = vmatmul.msk.f32.gmra.mxu2 %vm492_vm1, %v2216_v5  ;;  %2747 = vmatmul.msk.f32.gmra.mxu3 %vm492_vm1, %v2231_v7 }
 0x41f   : > { %2733 = vmatmul.msk.f32.gmra.mxu2 %vm492_vm1, %v2217_v52  ;;  %2748 = vmatmul.msk.f32.gmra.mxu3 %vm492_vm1, %v2232_v0 }
 0x427   : > { %2734 = vmatmul.msk.f32.gmra.mxu2 %vm492_vm1, %v2218_v36  ;;  %2749 = vmatmul.msk.f32.gmra.mxu3 %vm492_vm1, %v2233_v8 }
 0x42f   : > { %2735 = vmatmul.msk.f32.gmra.mxu2 %vm492_vm1, %v2219_v63  ;;  %2750 = vmatmul.msk.f32.gmra.mxu3 %vm492_vm1, %v2234_v35 }
 0x437   : > { %2736 = vmatmul.msk.f32.gmra.mxu2 %vm492_vm1, %v2220_v28  ;;  %2751 = vmatmul.msk.f32.gmra.mxu3 %vm492_vm1, %v2235_v27 }
 0x43f   : > { %2737 = vmatmul.msk.f32.gmra.mxu2 %vm492_vm1, %v2221_v50  ;;  %2752 = vmatmul.msk.f32.gmra.mxu3 %vm492_vm1, %v2236_v44 }
 0x447   : > { %2753 = vmatmul.msk.f32.gmra.mxu3 %vm492_vm1, %v2237_v22 }
 0x44f   : > { %2754 = vmatmul.msk.f32.gmra.mxu3 %vm492_vm1, %v2238_v45 }
 0x452   : > { %v2358_v38 = vpop.f32.mrf.mxu2  ;;  %v4568_v55 = vpop.f32.mrf.mxu3 }
 0x453   : > { %v2359_v29 = vadd.f32 %v4566_v54, %v2358_v38  ;;  %v2404_v44 = vadd.f32 %v4566_v54, %v4568_v55 }
 0x455   : > { %2454 = vxpose.xlu1.b32.start [1/16] (narrow) %v2359_v29, 16 }
 0x45a   : > { %v2361_v61 = vpop.f32.mrf.mxu2  ;;  %v2406_v37 = vpop.f32.mrf.mxu3 }
 0x45b   : > { %v2362_v10 = vadd.f32 %v4566_v54, %v2361_v61  ;;  %v2407_v3 = vadd.f32 %v4566_v54, %v2406_v37 }
 0x45d   : > { %2486 = vxpose.xlu2.b32.start [1/16] (narrow) %v2407_v3, 16  ;;  %2455 = vxpose.xlu1.b32.cont [2/16] (narrow) %v2362_v10, 16 }
 0x462   : > { %v2364_v46 = vpop.f32.mrf.mxu2  ;;  %v2409_v26 = vpop.f32.mrf.mxu3 }
 0x463   : > { %v2365_v33 = vadd.f32 %v4566_v54, %v2364_v46  ;;  %v2410_v42 = vadd.f32 %v4566_v54, %v2409_v26 }
 0x465   : > { %2487 = vxpose.xlu2.b32.cont [2/16] (narrow) %v2410_v42, 16  ;;  %2456 = vxpose.xlu1.b32.cont [3/16] (narrow) %v2365_v33, 16 }
 0x46a   : > { %v2367_v34 = vpop.f32.mrf.mxu2  ;;  %v2412_v12 = vpop.f32.mrf.mxu3 }
 0x46b   : > { %v2368_v49 = vadd.f32 %v4566_v54, %v2367_v34  ;;  %v2413_v20 = vadd.f32 %v4566_v54, %v2412_v12 }
 0x46d   : > { %2488 = vxpose.xlu2.b32.cont [3/16] (narrow) %v2413_v20, 16  ;;  %2457 = vxpose.xlu1.b32.cont [4/16] (narrow) %v2368_v49, 16 }
 0x472   : > { %v2370_v57 = vpop.f32.mrf.mxu2  ;;  %v2415_v58 = vpop.f32.mrf.mxu3 }
 0x473   : > { %v2371_v31 = vadd.f32 %v4566_v54, %v2370_v57  ;;  %v2416_v43 = vadd.f32 %v4566_v54, %v2415_v58 }
 0x475   : > { %2489 = vxpose.xlu2.b32.cont [4/16] (narrow) %v2416_v43, 16  ;;  %2458 = vxpose.xlu1.b32.cont [5/16] (narrow) %v2371_v31, 16 }
 0x47a   : > { %v2373_v18 = vpop.f32.mrf.mxu2  ;;  %v2418_v14 = vpop.f32.mrf.mxu3 }
 0x47b   : > { %v2374_v56 = vadd.f32 %v4566_v54, %v2373_v18  ;;  %v2419_v32 = vadd.f32 %v4566_v54, %v2418_v14 }
 0x47d   : > { %2490 = vxpose.xlu2.b32.cont [5/16] (narrow) %v2419_v32, 16  ;;  %2459 = vxpose.xlu1.b32.cont [6/16] (narrow) %v2374_v56, 16 }
 0x482   : > { %v2376_v51 = vpop.f32.mrf.mxu2  ;;  %v2421_v17 = vpop.f32.mrf.mxu3 }
 0x483   : > { %v2377_v21 = vadd.f32 %v4566_v54, %v2376_v51  ;;  %v2422_v25 = vadd.f32 %v4566_v54, %v2421_v17 }
 0x485   : > { %2491 = vxpose.xlu2.b32.cont [6/16] (narrow) %v2422_v25, 16  ;;  %2460 = vxpose.xlu1.b32.cont [7/16] (narrow) %v2377_v21, 16 }
 0x48a   : > { %v2379_v24 = vpop.f32.mrf.mxu2  ;;  %v2424_v39 = vpop.f32.mrf.mxu3 }
 0x48b   : > { %v2380_v11 = vadd.f32 %v4566_v54, %v2379_v24  ;;  %v2425_v53 = vadd.f32 %v4566_v54, %v2424_v39 }
 0x48d   : > { %2492 = vxpose.xlu2.b32.cont [7/16] (narrow) %v2425_v53, 16  ;;  %2461 = vxpose.xlu1.b32.cont [8/16] (narrow) %v2380_v11, 16 }
 0x492   : > { %v2382_v62 = vpop.f32.mrf.mxu2  ;;  %v2427_v13 = vpop.f32.mrf.mxu3 }
 0x493   : > { %v2383_v1 = vadd.f32 %v4566_v54, %v2382_v62  ;;  %v2428_v47 = vadd.f32 %v4566_v54, %v2427_v13 }
 0x495   : > { %2493 = vxpose.xlu2.b32.cont [8/16] (narrow) %v2428_v47, 16  ;;  %2462 = vxpose.xlu1.b32.cont [9/16] (narrow) %v2383_v1, 16 }
 0x49a   : > { %v2385_v60 = vpop.f32.mrf.mxu2  ;;  %v2430_v19 = vpop.f32.mrf.mxu3 }
 0x49b   : > { %v2386_v16 = vadd.f32 %v4566_v54, %v2385_v60  ;;  %v2431_v23 = vadd.f32 %v4566_v54, %v2430_v19 }
 0x49d   : > { %2494 = vxpose.xlu2.b32.cont [9/16] (narrow) %v2431_v23, 16  ;;  %2463 = vxpose.xlu1.b32.cont [10/16] (narrow) %v2386_v16, 16 }
 0x4a2   : > { %v2388_v4 = vpop.f32.mrf.mxu2  ;;  %v2433_v15 = vpop.f32.mrf.mxu3 }
 0x4a3   : > { %v2389_v59 = vadd.f32 %v4566_v54, %v2388_v4  ;;  %v2434_v48 = vadd.f32 %v4566_v54, %v2433_v15 }
 0x4a5   : > { %2495 = vxpose.xlu2.b32.cont [10/16] (narrow) %v2434_v48, 16  ;;  %2464 = vxpose.xlu1.b32.cont [11/16] (narrow) %v2389_v59, 16 }
 0x4aa   : > { %v2391_v41 = vpop.f32.mrf.mxu2  ;;  %v2436_v5 = vpop.f32.mrf.mxu3 }
 0x4ab   : > { %v2392_v7 = vadd.f32 %v4566_v54, %v2391_v41  ;;  %v2437_v30 = vadd.f32 %v4566_v54, %v2436_v5 }
 0x4ad   : > { %2496 = vxpose.xlu2.b32.cont [11/16] (narrow) %v2437_v30, 16  ;;  %2465 = vxpose.xlu1.b32.cont [12/16] (narrow) %v2392_v7, 16 }
 0x4b2   : > { %v2394_v52 = vpop.f32.mrf.mxu2  ;;  %v2439_v0 = vpop.f32.mrf.mxu3 }
 0x4b3   : > { %v2395_v2 = vadd.f32 %v4566_v54, %v2394_v52  ;;  %v2440_v36 = vadd.f32 %v4566_v54, %v2439_v0 }
 0x4b5   : > { %2497 = vxpose.xlu2.b32.cont [12/16] (narrow) %v2440_v36, 16  ;;  %2466 = vxpose.xlu1.b32.cont [13/16] (narrow) %v2395_v2, 16 }
 0x4ba   : > { %v2397_v8 = vpop.f32.mrf.mxu2  ;;  %v2442_v40 = vpop.f32.mrf.mxu3 }
 0x4bb   : > { %v2398_v63 = vadd.f32 %v4566_v54, %v2397_v8  ;;  %v2443_v35 = vadd.f32 %v4566_v54, %v2442_v40 }
 0x4bd   : > { %2498 = vxpose.xlu2.b32.cont [13/16] (narrow) %v2443_v35, 16  ;;  %2467 = vxpose.xlu1.b32.cont [14/16] (narrow) %v2398_v63, 16 }
 0x4c2   : > { %v2400_v6 = vpop.f32.mrf.mxu2  ;;  %v2445_v28 = vpop.f32.mrf.mxu3 }
 0x4c3   : > { %v2401_v27 = vadd.f32 %v4566_v54, %v2400_v6  ;;  %v2446_v9 = vadd.f32 %v4566_v54, %v2445_v28 }
 0x4c5   : > { %2499 = vxpose.xlu2.b32.cont [14/16] (narrow) %v2446_v9, 16  ;;  %2468 = vxpose.xlu1.b32.cont [15/16] (narrow) %v2401_v27, 16 }
 0x4ca   : > { %v2448_v50 = vpop.f32.mrf.mxu3 }
 0x4cb   : > { %v2449_v22 = vadd.f32 %v4566_v54, %v2448_v50 }
 0x4cd   : > { %2500 = vxpose.xlu2.b32.cont [15/16] (narrow) %v2449_v22, 16  ;;  %2469 = vxpose.xlu1.b32.end [16/16] (narrow) %v2404_v44, 16 }
 0x4d2   : > { %v2451_v45 = vpop.f32.mrf.mxu3 }
 0x4d3   : > { %v2452_v38 = vadd.f32 %v4566_v54, %v2451_v45 }
 0x4d5   : > { %2501 = vxpose.xlu2.b32.end [16/16] (narrow) %v2452_v38, 16 }
 0x4f6   : > { %v2502_v29 = vpop.trf.xlu2 }
 0x4f7   : > { %2519 = vst [vmem:[%s491_s2 + $0x8] sm:$0xff] %v2502_v29 }
 0x4f9   : > { %v2470_v61 = vpop.trf.xlu1 }
 0x4fa   : > { %2518 = vst [vmem:[%s491_s2] sm:$0xff] %v2470_v61 }
 0x4fe   : > { %v2503_v55 = vpop.trf.xlu2 }
 0x4ff   : > { %2521 = vst [vmem:[%s491_s2 + $0x18] sm:$0xff] %v2503_v55 }
 0x501   : > { %v2471_v54 = vpop.trf.xlu1 }
 0x502   : > { %2520 = vst [vmem:[%s491_s2 + $0x10] sm:$0xff] %v2471_v54 }
 0x503   : > { %3117 = shalt.err (!%p3114_p9)
}
 0x504   : > { %s3177_s23 = smov 256   ;;  %s3178_s1 = smov 16  }
 0x505   : > { %2791 = dma.vmem_to_hbm [thread:$0]  (%p3336_p5), %s2536_s12, 512, %s2538_s13, %s2523_s26, %s3177_s23, %s3177_s23, %s3178_s1  }
 0x506 PF: > { %s2552_s2 = sand.u32 1, %s3156_s17   ;;  %p4733_p10 = scmp.ge.s32.totalorder %s3168_s20, 2 }
 0x507   : > { %s2553_s6 = scalar_lea.sflag [#allocation5], %s2552_s2 }
 0x508   : > { %p2817_p13 = pnand %p4733_p10, %p3340_p6 }
 0x50a   : > { %p2818_p11 = pneg %p2817_p13 }
 0x50c   : > { %3151 = dma.done.wait (%p2818_p11), %s2553_s6, 512  }
 0x50d   : > { %3153 = vsyncadd (%p2818_p11), %s2553_s6, 4294966784  ;;  %p27_p0 = scmp.ge.s32.totalorder %s3310_s28, 4   ;;  %s4734_s17 = smov %s3160_s18 }
 0x50e   : > { %s4735_s18 = smov %s3164_s19  ;;  %s4736_s19 = smov %s3321_s15 }
 0x50f   : > { %s4737_s20 = smov %s3310_s28  ;;  %29 = sbr.rel (!%p27_p0) target bundleno = 15 (0xf), region = 136 }
 0x514   :  { %2559 = vsyncpa [#allocation4], 1 }
 0x515   :  { %2561 = vsyncpa [#allocation4 + $0x1], 1 }
 0x516   :  { %2562 = vsyncpa [#allocation7], 1 }
 0x517   :  { %2563 = vsyncpa [#allocation10], 1 }
 0x518   :  { %2564 = vsyncpa [#allocation13], 1 }
 0x519   :  { %2565 = vsyncpa [#allocation5], 1 }
 0x51a   :  { %2567 = vsyncpa [#allocation5 + $0x1], 1 }

</bundles_post_ra>
